<compile_context>
chip_gen: v5e
topology: v5e:2x2
jax: 0.10.0
libtpu: 0.0.40
codegen_flags: <defaults>
</compile_context>

<pallas_src>
import jax
import jax.numpy as jnp
from jax.experimental import pallas as pl
from jax.experimental.pallas import tpu as pltpu


# ---- model dims (from the PyTorch module __init__) -------------------------
C, H, W = 16, 200 // 2 ** 4, 200 // 2 ** 4          # 16, 12, 12
K_IN = C * H * W                                     # 16 * 144 = 2304
HIDDEN = 240
OUT = 7

# padded dims used inside the kernel (padding is zero -> math identical)
HIDDEN_PAD = 256     # lane-dense hidden (2 full lane-vregs), clean MXU K dim
OUT_PAD = 8          # block last dim == full array dim (legal); tiny writeback


def _round_up(x, m):
    return (x + m - 1) // m * m


def _cdiv(a, b):
    return (a + b - 1) // b


def _choose_tiling(B, tb_max):
    """Pick (tile_rows, padded_rows): tb multiple of 16 (bf16 packs 2 rows per
    sublane), >= 2 grid steps when there is enough work (v7x megacore), and
    pad waste bounded to ~one 16-row group per tile."""
    b16 = _round_up(B, 16)
    if b16 <= 32:                      # tiny batch: one tile, nothing to split
        return b16, b16
    n_tiles = max(2, _cdiv(b16, tb_max))
    if n_tiles % 2:                    # even step count -> balanced 2-TC split
        n_tiles += 1
    tb = _round_up(_cdiv(b16, n_tiles), 16)
    return tb, tb * n_tiles


# ---- kernel -----------------------------------------------------------------
def _head_kernel(x_ref, w1_ref, b1_ref, w2_ref, b2_ref, o_ref):
    # x_ref:  (TB, K_IN)            float32  (streamed; cast to bf16 in VMEM)
    # w1_ref: (K_IN, HIDDEN_PAD)    bfloat16 (VMEM-resident, index_map -> (0,0))
    # b1_ref: (1, HIDDEN_PAD)       float32
    # w2_ref: (HIDDEN_PAD, OUT_PAD) bfloat16
    # b2_ref: (1, OUT_PAD)          float32
    # o_ref:  (TB, OUT_PAD)         float32
    x = x_ref[...].astype(jnp.bfloat16)                    # VPU cast in VMEM
    h = jnp.dot(x, w1_ref[...], preferred_element_type=jnp.float32)
    h = jnp.maximum(h + b1_ref[...], 0.0)                  # bias + ReLU (f32)
    y = jnp.dot(h.astype(jnp.bfloat16), w2_ref[...],
                preferred_element_type=jnp.float32)
    y = y + b2_ref[...]
    # sigmoid: exp -> EUP, approx reciprocal -> EUP (VPU stays free)
    o_ref[...] = pl.reciprocal(1.0 + jnp.exp(-y), approx=True)


# ---- parameter preparation (run ONCE at model init, not per call) ----------
def prepare_params(w1, b1, w2, b2):
    """w1:(K_IN,HIDDEN) b1:(HIDDEN,) w2:(HIDDEN,OUT) b2:(OUT,)  (x @ W layout).
    Returns zero-padded / cast params ready for the kernel."""
    w1_p = jnp.pad(w1.astype(jnp.bfloat16), ((0, 0), (0, HIDDEN_PAD - HIDDEN)))
    b1_p = jnp.pad(b1.astype(jnp.float32),
                   ((0, HIDDEN_PAD - HIDDEN),)).reshape(1, HIDDEN_PAD)
    w2_p = jnp.pad(w2.astype(jnp.bfloat16),
                   ((0, HIDDEN_PAD - HIDDEN), (0, OUT_PAD - OUT)))
    b2_p = jnp.pad(b2.astype(jnp.float32),
                   ((0, OUT_PAD - OUT),)).reshape(1, OUT_PAD)
    return w1_p, b1_p, w2_p, b2_p


# ---- forward ----------------------------------------------------------------
def localizing_head(x_nchw, params, *, tb_max=1024):
    """x_nchw: (B, C, H, W) float32 -> (B, 7) float32."""
    w1_p, b1_p, w2_p, b2_p = params
    B = x_nchw.shape[0]
    x_flat = x_nchw.reshape(B, K_IN)          # same row order as torch .view

    tb, b_pad = _choose_tiling(B, tb_max)
    if b_pad != B:                            # small bounded pad (< one tile)
        x_flat = jnp.pad(x_flat, ((0, b_pad - B), (0, 0)))

    grid = (b_pad // tb,)
    cost = pl.CostEstimate(
        flops=2 * b_pad * K_IN * HIDDEN_PAD + 2 * b_pad * HIDDEN_PAD * OUT_PAD,
        transcendentals=2 * b_pad * OUT_PAD,
        bytes_accessed=(x_flat.size * 4 + w1_p.size * 2 + w2_p.size * 2
                        + (b1_p.size + b2_p.size) * 4 + b_pad * OUT_PAD * 4),
    )

    out_pad = pl.pallas_call(
        _head_kernel,
        out_shape=jax.ShapeDtypeStruct((b_pad, OUT_PAD), jnp.float32),
        grid=grid,
        in_specs=[
            pl.BlockSpec((tb, K_IN), lambda i: (i, 0)),           # x streamed
            pl.BlockSpec((K_IN, HIDDEN_PAD), lambda i: (0, 0)),   # resident
            pl.BlockSpec((1, HIDDEN_PAD), lambda i: (0, 0)),
            pl.BlockSpec((HIDDEN_PAD, OUT_PAD), lambda i: (0, 0)),
            pl.BlockSpec((1, OUT_PAD), lambda i: (0, 0)),
        ],
        out_specs=pl.BlockSpec((tb, OUT_PAD), lambda i: (i, 0)),
        compiler_params=pltpu.CompilerParams(
            dimension_semantics=("parallel",),
            vmem_limit_bytes=48 * 1024 * 1024,   # tb=1024 f32 x needs > v5e's 16 MiB default
        ),
        cost_estimate=cost,
    )(x_flat, w1_p, b1_p, w2_p, b2_p)

    return out_pad[:B, :OUT]


# ---- synthetic init matching nn.Linear --------------------------------------
def init_params(key):
    """nn.Linear stores (out, in); we keep the transposed (in, out) layout so
    the kernel does x @ W directly."""
    k1, k2, k3, k4 = jax.random.split(key, 4)
    bound1 = 1.0 / jnp.sqrt(K_IN)
    bound2 = 1.0 / jnp.sqrt(HIDDEN)
    w1 = jax.random.uniform(k1, (K_IN, HIDDEN), jnp.float32, -bound1, bound1)
    b1 = jax.random.uniform(k2, (HIDDEN,), jnp.float32, -bound1, bound1)
    w2 = jax.random.uniform(k3, (HIDDEN, OUT), jnp.float32, -bound2, bound2)
    b2 = jax.random.uniform(k4, (OUT,), jnp.float32, -bound2, bound2)
    return w1, b1, w2, b2


if __name__ == "__main__":
    key = jax.random.PRNGKey(0)
    kx, kp = jax.random.split(key)

    B = 2
    x = jax.random.normal(kx, (B, C, H, W), jnp.float32)      # NCHW like PyTorch
    w1, b1, w2, b2 = init_params(kp)
    params = prepare_params(w1, b1, w2, b2)                    # once, at "init"

    out = localizing_head(x, params)
    out = jax.block_until_ready(out)

    # reference check in plain f32 JAX (tolerance loosened for bf16 matmul
    # inputs + approx reciprocal; sigmoid output is bounded in [0, 1])
    ref = jax.nn.sigmoid(
        jnp.maximum(x.reshape(B, -1) @ w1 + b1, 0.0) @ w2 + b2
    )
    assert out.shape == (B, OUT)
    assert jnp.allclose(out, ref, atol=2e-2, rtol=2e-2), (
        f"max abs err {jnp.max(jnp.abs(out - ref))}")

    print("KERNEL_OK")
</pallas_src>

<mosaic_0001>
module attributes {stable_mosaic.version = 11 : i64} {
  func.func @_head_kernel(%arg0: i32, %arg1: memref<16x2304xf32, #tpu.memory_space<vmem>>, %arg2: memref<2304x256xbf16, #tpu.memory_space<vmem>>, %arg3: memref<1x256xf32, #tpu.memory_space<vmem>>, %arg4: memref<256x8xbf16, #tpu.memory_space<vmem>>, %arg5: memref<1x8xf32, #tpu.memory_space<vmem>>, %arg6: memref<16x8xf32, #tpu.memory_space<vmem>>) attributes {dimension_semantics = [#tpu.dimension_semantics<parallel>], iteration_bounds = array<i64: 1>, scalar_prefetch = 0 : i64, scratch_operands = 0 : i64, tpu.core_type = #tpu.core_type<tc>, window_params = [{transform_indices = @transform_0, window_bounds = array<i64: 16, 2304>}, {pipeline_mode = #tpu.pipeline_mode<synchronous>, transform_indices = @transform_1, window_bounds = array<i64: 2304, 256>}, {pipeline_mode = #tpu.pipeline_mode<synchronous>, transform_indices = @transform_2, window_bounds = array<i64: 1, 256>}, {pipeline_mode = #tpu.pipeline_mode<synchronous>, transform_indices = @transform_3, window_bounds = array<i64: 256, 8>}, {pipeline_mode = #tpu.pipeline_mode<synchronous>, transform_indices = @transform_4, window_bounds = array<i64: 1, 8>}, {transform_indices = @transform_5, window_bounds = array<i64: 16, 8>}]} {
    %c0 = arith.constant 0 : index
    %c0_0 = arith.constant 0 : index
    %0 = vector.load %arg1[%c0, %c0_0] : memref<16x2304xf32, #tpu.memory_space<vmem>>, vector<16x2304xf32>
    %1 = arith.truncf %0 : vector<16x2304xf32> to vector<16x2304xbf16>
    %c0_1 = arith.constant 0 : index
    %c0_2 = arith.constant 0 : index
    %2 = vector.load %arg2[%c0_1, %c0_2] : memref<2304x256xbf16, #tpu.memory_space<vmem>>, vector<2304x256xbf16>
    %cst = arith.constant dense<0.000000e+00> : vector<16x256xf32>
    %3 = tpu.matmul %1, %2, %cst {dimension_numbers = #tpu.dot_dimension_numbers<[1], [0], [0], [1], [0, 0, 1, 1], [], []>} : vector<16x2304xbf16>, vector<2304x256xbf16>, vector<16x256xf32> -> vector<16x256xf32>
    %c0_3 = arith.constant 0 : index
    %c0_4 = arith.constant 0 : index
    %4 = vector.load %arg3[%c0_3, %c0_4] : memref<1x256xf32, #tpu.memory_space<vmem>>, vector<1x256xf32>
    %5 = vector.broadcast %4 : vector<1x256xf32> to vector<16x256xf32>
    %6 = arith.addf %3, %5 : vector<16x256xf32>
    %cst_5 = arith.constant 0.000000e+00 : f32
    %7 = vector.broadcast %cst_5 : f32 to vector<16x256xf32>
    %8 = arith.maximumf %6, %7 : vector<16x256xf32>
    %9 = arith.truncf %8 : vector<16x256xf32> to vector<16x256xbf16>
    %c0_6 = arith.constant 0 : index
    %c0_7 = arith.constant 0 : index
    %10 = vector.load %arg4[%c0_6, %c0_7] : memref<256x8xbf16, #tpu.memory_space<vmem>>, vector<256x8xbf16>
    %cst_8 = arith.constant dense<0.000000e+00> : vector<16x8xf32>
    %11 = tpu.matmul %9, %10, %cst_8 {dimension_numbers = #tpu.dot_dimension_numbers<[1], [0], [0], [1], [0, 0, 1, 1], [], []>} : vector<16x256xbf16>, vector<256x8xbf16>, vector<16x8xf32> -> vector<16x8xf32>
    %c0_9 = arith.constant 0 : index
    %c0_10 = arith.constant 0 : index
    %12 = vector.load %arg5[%c0_9, %c0_10] : memref<1x8xf32, #tpu.memory_space<vmem>>, vector<1x8xf32>
    %13 = vector.broadcast %12 : vector<1x8xf32> to vector<16x8xf32>
    %14 = arith.addf %11, %13 : vector<16x8xf32>
    %cst_11 = arith.constant 0.000000e+00 : f32
    %15 = vector.broadcast %cst_11 : f32 to vector<16x8xf32>
    %16 = arith.subf %15, %14 : vector<16x8xf32>
    %17 = math.exp %16 : vector<16x8xf32>
    %cst_12 = arith.constant 1.000000e+00 : f32
    %18 = vector.broadcast %cst_12 : f32 to vector<16x8xf32>
    %19 = arith.addf %18, %17 : vector<16x8xf32>
    %20 = tpu.reciprocal %19 {approx = true} : vector<16x8xf32> -> vector<16x8xf32>
    %c0_13 = arith.constant 0 : index
    %c0_14 = arith.constant 0 : index
    %21 = vector.load %arg6[%c0_13, %c0_14] : memref<16x8xf32, #tpu.memory_space<vmem>>, vector<16x8xf32>
    tpu.vector_store %arg6[%c0_13, %c0_14], %20 {strides = array<i32>} : memref<16x8xf32, #tpu.memory_space<vmem>>, vector<16x8xf32>,
    return
  }
  func.func @transform_0(%arg0: i32) -> (i32, i32) {
    %c0_i32 = arith.constant 0 : i32
    %c0_i32_0 = arith.constant 0 : i32
    return %arg0, %c0_i32 : i32, i32
  }
  func.func @transform_1(%arg0: i32) -> (i32, i32) {
    %c0_i32 = arith.constant 0 : i32
    %c0_i32_0 = arith.constant 0 : i32
    %c0_i32_1 = arith.constant 0 : i32
    return %c0_i32, %c0_i32_0 : i32, i32
  }
  func.func @transform_2(%arg0: i32) -> (i32, i32) {
    %c0_i32 = arith.constant 0 : i32
    %c0_i32_0 = arith.constant 0 : i32
    %c0_i32_1 = arith.constant 0 : i32
    return %c0_i32, %c0_i32_0 : i32, i32
  }
  func.func @transform_3(%arg0: i32) -> (i32, i32) {
    %c0_i32 = arith.constant 0 : i32
    %c0_i32_0 = arith.constant 0 : i32
    %c0_i32_1 = arith.constant 0 : i32
    return %c0_i32, %c0_i32_0 : i32, i32
  }
  func.func @transform_4(%arg0: i32) -> (i32, i32) {
    %c0_i32 = arith.constant 0 : i32
    %c0_i32_0 = arith.constant 0 : i32
    %c0_i32_1 = arith.constant 0 : i32
    return %c0_i32, %c0_i32_0 : i32, i32
  }
  func.func @transform_5(%arg0: i32) -> (i32, i32) {
    %c0_i32 = arith.constant 0 : i32
    %c0_i32_0 = arith.constant 0 : i32
    return %arg0, %c0_i32 : i32, i32
  }
}

</mosaic_0001>

<bundles_post_ra>
// kernel: tpu_custom_call.1
= control target key start
LH: loop header
LB: loop body
LE: loop exit
PB: predicated region body
PF: predicated region fallthrough
CT: control target
= control target key end

     0   :  { %10 = vsyncpa [#allocation3], 0  ;;  %s4439_s0 = inlined_call_operand.hbm [shape: f32[16,2304], index: 0, kind: input, shape index: {}]   ;;  %s4440_s1 = inlined_call_operand.hbm [shape: bf16[2304,256], index: 1, kind: input, shape index: {}]   ;;  %s4441_s2 = inlined_call_operand.hbm [shape: f32[1,256], index: 2, kind: input, shape index: {}]   ;;  %s4442_s3 = inlined_call_operand.vmem [shape: bf16[256,8], index: 3, kind: input, shape index: {}]   ;;  %s4443_s4 = inlined_call_operand.hbm [shape: f32[1,8], index: 4, kind: input, shape index: {}]   ;;  %s4444_s5 = inlined_call_operand.vmem [shape: f32[16,8], index: 5, kind: output, shape index: {}]  }
   0x1   :  { %11 = vsyncpa [#allocation5], 0  ;;  %s30_s20 = sshll.u32 %s4440_s1, 4  ;;  %s31_s20 = int_to_ptr.hbm [resolvable:$true] %s30_s20 }
   0x2   :  { %12 = vsyncpa [#allocation8], 0  ;;  %s4196_s21 = smov [#allocation4]   ;;  %s17_s25 = sshll.u32 %s4439_s0, 4  ;;  %s18_s25 = int_to_ptr.hbm [resolvable:$true] %s17_s25 }
   0x3   :  { %s32_s22 = sshll.u32 %s4196_s21, 4  ;;  %s4197_s26 = smov 128   ;;  %s33_s22 = int_to_ptr.vmem [resolvable:$true] %s32_s22 }
   0x4   :  { %s4198_s27 = smov 8   ;;  %s4199_s28 = smov [#allocation2]  }
   0x5   :  { %38 = dma.hbm_to_vmem [thread:$0]  %s31_s20, 36864, %s33_s22, [#allocation5], %s4197_s26, %s4197_s26, %s4198_s27  }
   0x6   :  { %s19_s29 = sshll.u32 %s4199_s28, 4  ;;  %s4200_s30 = smov 2304   ;;  %s20_s29 = int_to_ptr.vmem [resolvable:$true] %s19_s29 }
   0x7   :  { %s4201_s6 = smov 144   ;;  %s44_s8 = sshll.u32 %s4441_s2, 4  ;;  %s45_s8 = int_to_ptr.hbm [resolvable:$true] %s44_s8 }
   0x8   :  { %25 = dma.hbm_to_vmem [thread:$0]  %s18_s25, 4608, %s20_s29, [#allocation3], %s4200_s30, %s4200_s30, %s4201_s6  }
   0x9   :  { %s4202_s9 = smov [#allocation6]   ;;  %s57_s12 = sshll.u32 %s4443_s4, 4  ;;  %s58_s12 = int_to_ptr.hbm [resolvable:$true] %s57_s12 }
   0xa   :  { %s46_s10 = sshll.u32 %s4202_s9, 4  ;;  %s4203_s13 = smov [#allocation7]   ;;  %s47_s10 = int_to_ptr.vmem [resolvable:$true] %s46_s10 }
   0xb   :  { %49 = dma.hbm_to_vmem [thread:$0]  %s45_s8, 32, %s47_s10, [#allocation5]  }
   0xc   :  { %s59_s14 = sshll.u32 %s4203_s13, 4  ;;  %s60_s14 = int_to_ptr.vmem [resolvable:$true] %s59_s14 }
   0xd   :  { %62 = dma.hbm_to_vmem [thread:$0]  %s58_s12, 16, %s60_s14, [#allocation8]  }
   0xe   :  { %4190 = dma.done.wait [#allocation3], 4608  }
   0xf   :  { %4191 = vsyncadd [#allocation3], 4294962688 }
  0x10   :  { %4192 = dma.done.wait [#allocation5], 36896  }
  0x11   :  { %4193 = vsyncadd [#allocation5], 4294930400 }
  0x12   :  { %4194 = dma.done.wait [#allocation8], 16  }
  0x13   :  { %4195 = vsyncadd [#allocation8], 4294967280  ;;  %v2615_v0 = vld [vmem:[#allocation4 + $0x70] sm:$0xf]  ;;  %v3788_v1 = vld [vmem:[#allocation4 + $0x74] sm:$0xf0] }
  0x14   :  { %v2679_v2 = vld [vmem:[#allocation4 + $0xf0] sm:$0xf]  ;;  %v2616_v3 = vor.u32 %v3788_v1, %v2615_v0  ;;  %v3804_v4 = vld [vmem:[#allocation4 + $0xf4] sm:$0xf0]  ;;  %v2607_v11 = vld [vmem:[#allocation4 + $0x60] sm:$0xf] }
  0x15   :  { %v2743_v5 = vld [vmem:[#allocation4 + $0x170] sm:$0xf]  ;;  %v3820_v6 = vld [vmem:[#allocation4 + $0x174] sm:$0xf0]  ;;  %v2680_v7 = vor.u32 %v3804_v4, %v2679_v2  ;;  %v3786_v13 = vld [vmem:[#allocation4 + $0x64] sm:$0xf0] }
  0x16   :  { %v2744_v8 = vor.u32 %v3820_v6, %v2743_v5  ;;  %v2807_v9 = vld [vmem:[#allocation4 + $0x1f0] sm:$0xf]  ;;  %v3836_v10 = vld [vmem:[#allocation4 + $0x1f4] sm:$0xf0]  ;;  %1867 = vmatpush.bf16.msra.mxu0 %v2616_v3  ;;  %v2671_v14 = vld [vmem:[#allocation4 + $0xe0] sm:$0xf]  ;;  %v2608_v16 = vor.u32 %v3786_v13, %v2607_v11 }
  0x17   :  { %v2808_v12 = vor.u32 %v3836_v10, %v2807_v9  ;;  %v3802_v15 = vld [vmem:[#allocation4 + $0xe4] sm:$0xf0]  ;;  %1881 = vmatpush.bf16.msra.mxu1 %v2680_v7  ;;  %v2735_v18 = vld [vmem:[#allocation4 + $0x160] sm:$0xf]  ;;  %v2599_v23 = vld [vmem:[#allocation4 + $0x50] sm:$0xf] }
  0x18   :  { %1895 = vmatpush.bf16.msra.mxu2 %v2744_v8  ;;  %v2672_v17 = vor.u32 %v3802_v15, %v2671_v14  ;;  %v3818_v19 = vld [vmem:[#allocation4 + $0x164] sm:$0xf0]  ;;  %v2799_v20 = vld [vmem:[#allocation4 + $0x1e0] sm:$0xf]  ;;  %v3784_v24 = vld [vmem:[#allocation4 + $0x54] sm:$0xf0] }
  0x19   :  { %1909 = vmatpush.bf16.msra.mxu3 %v2808_v12  ;;  %v2736_v21 = vor.u32 %v3818_v19, %v2735_v18  ;;  %v3834_v22 = vld [vmem:[#allocation4 + $0x1e4] sm:$0xf0]  ;;  %v2663_v26 = vld [vmem:[#allocation4 + $0xd0] sm:$0xf]  ;;  %v3800_v27 = vld [vmem:[#allocation4 + $0xd4] sm:$0xf0]  ;;  %v2600_v29 = vor.u32 %v3784_v24, %v2599_v23 }
  0x1a   :  { %v2800_v25 = vor.u32 %v3834_v22, %v2799_v20  ;;  %v2727_v28 = vld [vmem:[#allocation4 + $0x150] sm:$0xf]  ;;  %1868 = vmatpush.bf16.msra.mxu0 %v2608_v16  ;;  %v3816_v30 = vld [vmem:[#allocation4 + $0x154] sm:$0xf0]  ;;  %v2664_v33 = vor.u32 %v3800_v27, %v2663_v26  ;;  %v2591_v35 = vld [vmem:[#allocation4 + $0x40] sm:$0xf] }
  0x1b   :  { %v2791_v31 = vld [vmem:[#allocation4 + $0x1d0] sm:$0xf]  ;;  %v3832_v32 = vld [vmem:[#allocation4 + $0x1d4] sm:$0xf0]  ;;  %1882 = vmatpush.bf16.msra.mxu1 %v2672_v17  ;;  %v2728_v34 = vor.u32 %v3816_v30, %v2727_v28  ;;  %v3782_v36 = vld [vmem:[#allocation4 + $0x44] sm:$0xf0] }
  0x1c   :  { %1896 = vmatpush.bf16.msra.mxu2 %v2736_v21  ;;  %v2655_v37 = vld [vmem:[#allocation4 + $0xc0] sm:$0xf]  ;;  %v2792_v38 = vor.u32 %v3832_v32, %v2791_v31  ;;  %v3798_v39 = vld [vmem:[#allocation4 + $0xc4] sm:$0xf0]  ;;  %v2592_v44 = vor.u32 %v3782_v36, %v2591_v35  ;;  %v2583_v47 = vld [vmem:[#allocation4 + $0x30] sm:$0xf] }
  0x1d   :  { %1910 = vmatpush.bf16.msra.mxu3 %v2800_v25  ;;  %v2719_v40 = vld [vmem:[#allocation4 + $0x140] sm:$0xf]  ;;  %v3814_v41 = vld [vmem:[#allocation4 + $0x144] sm:$0xf0]  ;;  %v2656_v45 = vor.u32 %v3798_v39, %v2655_v37  ;;  %v3780_v48 = vld [vmem:[#allocation4 + $0x34] sm:$0xf0] }
  0x1e   :  { %v2783_v42 = vld [vmem:[#allocation4 + $0x1c0] sm:$0xf]  ;;  %v3830_v43 = vld [vmem:[#allocation4 + $0x1c4] sm:$0xf0]  ;;  %1869 = vmatpush.bf16.msra.mxu0 %v2600_v29  ;;  %v2720_v46 = vor.u32 %v3814_v41, %v2719_v40  ;;  %v2647_v49 = vld [vmem:[#allocation4 + $0xb0] sm:$0xf]  ;;  %v2584_v56 = vor.u32 %v3780_v48, %v2583_v47 }
  0x1f   :  { %1883 = vmatpush.bf16.msra.mxu1 %v2664_v33  ;;  %v2784_v50 = vor.u32 %v3830_v43, %v2783_v42  ;;  %v3796_v51 = vld [vmem:[#allocation4 + $0xb4] sm:$0xf0]  ;;  %v2711_v52 = vld [vmem:[#allocation4 + $0x130] sm:$0xf]  ;;  %v2575_v59 = vld [vmem:[#allocation4 + $0x20] sm:$0xf] }
  0x20   :  { %1897 = vmatpush.bf16.msra.mxu2 %v2728_v34  ;;  %v3812_v53 = vld [vmem:[#allocation4 + $0x134] sm:$0xf0]  ;;  %v2775_v54 = vld [vmem:[#allocation4 + $0x1b0] sm:$0xf]  ;;  %v2648_v57 = vor.u32 %v3796_v51, %v2647_v49  ;;  %v3778_v60 = vld [vmem:[#allocation4 + $0x24] sm:$0xf0] }
  0x21   :  { %1911 = vmatpush.bf16.msra.mxu3 %v2792_v38  ;;  %v3828_v55 = vld [vmem:[#allocation4 + $0x1b4] sm:$0xf0]  ;;  %v2712_v58 = vor.u32 %v3812_v53, %v2711_v52  ;;  %v2639_v61 = vld [vmem:[#allocation4 + $0xa0] sm:$0xf]  ;;  %v3794_v63 = vld [vmem:[#allocation4 + $0xa4] sm:$0xf0]  ;;  %v2576_v4 = vor.u32 %v3778_v60, %v2575_v59 }
  0x22   :  { %1870 = vmatpush.bf16.msra.mxu0 %v2592_v44  ;;  %v2776_v62 = vor.u32 %v3828_v55, %v2775_v54  ;;  %v2703_v0 = vld [vmem:[#allocation4 + $0x120] sm:$0xf]  ;;  %v3810_v1 = vld [vmem:[#allocation4 + $0x124] sm:$0xf0]  ;;  %v2640_v5 = vor.u32 %v3794_v63, %v2639_v61  ;;  %v2567_v7 = vld [vmem:[#allocation4 + $0x10] sm:$0xf] }
  0x23   :  { %1884 = vmatpush.bf16.msra.mxu1 %v2656_v45  ;;  %v2767_v2 = vld [vmem:[#allocation4 + $0x1a0] sm:$0xf]  ;;  %v3826_v3 = vld [vmem:[#allocation4 + $0x1a4] sm:$0xf0]  ;;  %v2704_v6 = vor.u32 %v3810_v1, %v2703_v0  ;;  %v3776_v8 = vld [vmem:[#allocation4 + $0x14] sm:$0xf0] }
  0x24   :  { %1898 = vmatpush.bf16.msra.mxu2 %v2720_v46  ;;  %v2631_v9 = vld [vmem:[#allocation4 + $0x90] sm:$0xf]  ;;  %v2768_v10 = vor.u32 %v3826_v3, %v2767_v2  ;;  %v3792_v11 = vld [vmem:[#allocation4 + $0x94] sm:$0xf0]  ;;  %v2568_v16 = vor.u32 %v3776_v8, %v2567_v7  ;;  %v2559_v17 = vld [vmem:[#allocation4] sm:$0xf] }
  0x25   :  { %1912 = vmatpush.bf16.msra.mxu3 %v2784_v50  ;;  %v2695_v12 = vld [vmem:[#allocation4 + $0x110] sm:$0xf]  ;;  %v3808_v13 = vld [vmem:[#allocation4 + $0x114] sm:$0xf0]  ;;  %v3774_v18 = vld [vmem:[#allocation4 + $0x4] sm:$0xf0]  ;;  %v2632_v19 = vor.u32 %v3792_v11, %v2631_v9 }
  0x26   :  { %1871 = vmatpush.bf16.msra.mxu0 %v2584_v56  ;;  %v2759_v14 = vld [vmem:[#allocation4 + $0x190] sm:$0xf]  ;;  %v3824_v15 = vld [vmem:[#allocation4 + $0x194] sm:$0xf0]  ;;  %v2696_v20 = vor.u32 %v3808_v13, %v2695_v12  ;;  %v2623_v21 = vld [vmem:[#allocation4 + $0x80] sm:$0xf]  ;;  %v2560_v31 = vor.u32 %v3774_v18, %v2559_v17 }
  0x27   :  { %1885 = vmatpush.bf16.msra.mxu1 %v2648_v57  ;;  %v3790_v22 = vld [vmem:[#allocation4 + $0x84] sm:$0xf0]  ;;  %v2687_v23 = vld [vmem:[#allocation4 + $0x100] sm:$0xf]  ;;  %v2760_v24 = vor.u32 %v3824_v15, %v2759_v14  ;;  %v2871_v28 = vld [vmem:[#allocation4 + $0x270] sm:$0xf] }
  0x28   :  { %1899 = vmatpush.bf16.msra.mxu2 %v2712_v58  ;;  %v3806_v25 = vld [vmem:[#allocation4 + $0x104] sm:$0xf0]  ;;  %v2751_v26 = vld [vmem:[#allocation4 + $0x180] sm:$0xf]  ;;  %v3852_v29 = vld [vmem:[#allocation4 + $0x274] sm:$0xf0]  ;;  %v2624_v35 = vor.u32 %v3790_v22, %v2623_v21 }
  0x29   :  { %1913 = vmatpush.bf16.msra.mxu3 %v2776_v62  ;;  %v3822_v27 = vld [vmem:[#allocation4 + $0x184] sm:$0xf0]  ;;  %v2935_v30 = vld [vmem:[#allocation4 + $0x2f0] sm:$0xf]  ;;  %v3868_v32 = vld [vmem:[#allocation4 + $0x2f4] sm:$0xf0]  ;;  %v2688_v36 = vor.u32 %v3806_v25, %v2687_v23  ;;  %v2872_v40 = vor.u32 %v3852_v29, %v2871_v28 }
  0x2a   :  { %1872 = vmatpush.bf16.msra.mxu0 %v2576_v4  ;;  %v2999_v33 = vld [vmem:[#allocation4 + $0x370] sm:$0xf]  ;;  %v3884_v34 = vld [vmem:[#allocation4 + $0x374] sm:$0xf0]  ;;  %v2752_v39 = vor.u32 %v3822_v27, %v2751_v26  ;;  %v2863_v41 = vld [vmem:[#allocation4 + $0x260] sm:$0xf]  ;;  %v2936_v43 = vor.u32 %v3868_v32, %v2935_v30 }
  0x2b   :  { %1886 = vmatpush.bf16.msra.mxu1 %v2640_v5  ;;  %v3063_v37 = vld [vmem:[#allocation4 + $0x3f0] sm:$0xf]  ;;  %v3900_v38 = vld [vmem:[#allocation4 + $0x3f4] sm:$0xf0]  ;;  %v3850_v42 = vld [vmem:[#allocation4 + $0x264] sm:$0xf0]  ;;  %v3000_v44 = vor.u32 %v3884_v34, %v2999_v33 }
  0x2c   :  { %1900 = vmatpush.bf16.msra.mxu2 %v2704_v6  ;;  %v2927_v45 = vld [vmem:[#allocation4 + $0x2e0] sm:$0xf]  ;;  %v3866_v46 = vld [vmem:[#allocation4 + $0x2e4] sm:$0xf0]  ;;  %v3064_v48 = vor.u32 %v3900_v38, %v3063_v37  ;;  %v97_v53 = vld [vmem:[#allocation2 + $0x90] sm:$0xff]  ;;  %v2864_v55 = vor.u32 %v3850_v42, %v2863_v41  ;;  %vm2547_vm0 = vcmask 64512  }
  0x2d   :  { %1914 = vmatpush.bf16.msra.mxu3 %v2768_v10  ;;  %v2991_v47 = vld [vmem:[#allocation4 + $0x360] sm:$0xf]  ;;  %v3882_v49 = vld [vmem:[#allocation4 + $0x364] sm:$0xf0]  ;;  %v81_v54 = vld [vmem:[#allocation2 + $0x10] sm:$0xff]  ;;  %v2928_v60 = vor.u32 %v3866_v46, %v2927_v45 }
  0x2e   :  { %1873 = vmatpush.bf16.msra.mxu0 %v2568_v16  ;;  %v3055_v50 = vld [vmem:[#allocation4 + $0x3e0] sm:$0xf]  ;;  %v3898_v51 = vld [vmem:[#allocation4 + $0x3e4] sm:$0xf0]  ;;  %v2855_v56 = vld [vmem:[#allocation4 + $0x250] sm:$0xf]  ;;  %v2992_v61 = vor.u32 %v3882_v49, %v2991_v47 }
  0x2f   :  { %1887 = vmatpush.bf16.msra.mxu1 %v2632_v19  ;;  %v79_v52 = vld [vmem:[#allocation2] sm:$0xff]  ;;  %v3848_v57 = vld [vmem:[#allocation4 + $0x254] sm:$0xf0]  ;;  %v2919_v62 = vld [vmem:[#allocation4 + $0x2d0] sm:$0xf]  ;;  %v3056_v2 = vor.u32 %v3898_v51, %v3055_v50 }
  0x30   :  { %1901 = vmatpush.bf16.msra.mxu2 %v2696_v20  ;;  %v4246_v58 = vpack.c.bf16 %v97_v53, %v79_v52  ;;  %v99_v59 = vld [vmem:[#allocation2 + $0xa0] sm:$0xff]  ;;  %v3864_v63 = vld [vmem:[#allocation4 + $0x2d4] sm:$0xf0]  ;;  %v2983_v0 = vld [vmem:[#allocation4 + $0x350] sm:$0xf]  ;;  %v2856_v9 = vor.u32 %v3848_v57, %v2855_v56 }
  0x31   :  { %1915 = vmatpush.bf16.msra.mxu3 %v2760_v24  ;;  %v4248_v1 = vpack.c.bf16 %v99_v59, %v81_v54  ;;  %v3880_v3 = vld [vmem:[#allocation4 + $0x354] sm:$0xf0]  ;;  %v3047_v4 = vld [vmem:[#allocation4 + $0x3d0] sm:$0xf]  ;;  %v80_v6 = vld [vmem:[#allocation2 + $0x8] sm:$0xff]  ;;  %v2920_v12 = vor.u32 %v3864_v63, %v2919_v62 }
  0x32   :  { %1874 = vmatpush.bf16.msra.mxu0 %v2560_v31  ;;  %v3896_v5 = vld [vmem:[#allocation4 + $0x3d4] sm:$0xf0]  ;;  %v100_v11 = vld [vmem:[#allocation2 + $0xa8] sm:$0xff]  ;;  %v2984_v13 = vor.u32 %v3880_v3, %v2983_v0  ;;  %v2847_v14 = vld [vmem:[#allocation4 + $0x240] sm:$0xf] }
  0x33   :  { %1888 = vmatpush.bf16.msra.mxu1 %v2624_v35  ;;  %v98_v7 = vld [vmem:[#allocation2 + $0x98] sm:$0xff]  ;;  %v3846_v15 = vld [vmem:[#allocation4 + $0x244] sm:$0xf0]  ;;  %v2911_v16 = vld [vmem:[#allocation4 + $0x2c0] sm:$0xf]  ;;  %v3048_v18 = vor.u32 %v3896_v5, %v3047_v4 }
  0x34   :  { %1902 = vmatpush.bf16.msra.mxu2 %v2688_v36  ;;  %v82_v8 = vld [vmem:[#allocation2 + $0x18] sm:$0xff]  ;;  %v4252_v10 = vpack.c.bf16 %v98_v7, %v80_v6  ;;  %v3862_v19 = vld [vmem:[#allocation4 + $0x2c4] sm:$0xf0]  ;;  %v2975_v20 = vld [vmem:[#allocation4 + $0x340] sm:$0xf]  ;;  %v2848_v24 = vor.u32 %v3846_v15, %v2847_v14 }
  0x35   :  { %1916 = vmatpush.bf16.msra.mxu3 %v2752_v39  ;;  %1875 = vmatmul.bf16.vlgmr.msra.gmra.mxu0 %v4246_v58  ;;  %v4254_v17 = vpack.c.bf16 %v100_v11, %v82_v8  ;;  %v3878_v21 = vld [vmem:[#allocation4 + $0x344] sm:$0xf0]  ;;  %v3039_v22 = vld [vmem:[#allocation4 + $0x3c0] sm:$0xf]  ;;  %v2912_v25 = vor.u32 %v3862_v19, %v2911_v16  ;;  %v2839_v27 = vld [vmem:[#allocation4 + $0x230] sm:$0xf] }
  0x36   :  { %1923 = vmatpush.bf16.msrb.mxu0 %v2872_v40  ;;  %1889 = vmatmul.bf16.vlgmr.msra.gmra.mxu1 %v4252_v10  ;;  %v3894_v23 = vld [vmem:[#allocation4 + $0x3c4] sm:$0xf0]  ;;  %v2976_v26 = vor.u32 %v3878_v21, %v2975_v20  ;;  %v3844_v28 = vld [vmem:[#allocation4 + $0x234] sm:$0xf0]  ;;  %v2903_v29 = vld [vmem:[#allocation4 + $0x2b0] sm:$0xf] }
  0x37   :  { %1937 = vmatpush.bf16.msrb.mxu1 %v2936_v43  ;;  %1903 = vmatmul.bf16.vlgmr.msra.gmra.mxu2 %v4248_v1  ;;  %v3040_v30 = vor.u32 %v3894_v23, %v3039_v22  ;;  %v3860_v31 = vld [vmem:[#allocation4 + $0x2b4] sm:$0xf0]  ;;  %v2967_v32 = vld [vmem:[#allocation4 + $0x330] sm:$0xf]  ;;  %v2840_v36 = vor.u32 %v3844_v28, %v2839_v27  ;;  %v2831_v39 = vld [vmem:[#allocation4 + $0x220] sm:$0xf] }
  0x38   :  { %1951 = vmatpush.bf16.msrb.mxu2 %v3000_v44  ;;  %1917 = vmatmul.bf16.vlgmr.msra.gmra.mxu3 %v4254_v17  ;;  %v3876_v33 = vld [vmem:[#allocation4 + $0x334] sm:$0xf0]  ;;  %v3031_v34 = vld [vmem:[#allocation4 + $0x3b0] sm:$0xf]  ;;  %v2904_v37 = vor.u32 %v3860_v31, %v2903_v29  ;;  %v3842_v40 = vld [vmem:[#allocation4 + $0x224] sm:$0xf0] }
  0x39   :  { %1965 = vmatpush.bf16.msrb.mxu3 %v3064_v48  ;;  %v3892_v35 = vld [vmem:[#allocation4 + $0x3b4] sm:$0xf0]  ;;  %v2968_v38 = vor.u32 %v3876_v33, %v2967_v32  ;;  %v2895_v41 = vld [vmem:[#allocation4 + $0x2a0] sm:$0xf]  ;;  %v3858_v43 = vld [vmem:[#allocation4 + $0x2a4] sm:$0xf0]  ;;  %v2832_v48 = vor.u32 %v3842_v40, %v2831_v39 }
  0x3a   :  { %1924 = vmatpush.bf16.msrb.mxu0 %v2864_v55  ;;  %v3032_v42 = vor.u32 %v3892_v35, %v3031_v34  ;;  %v2959_v44 = vld [vmem:[#allocation4 + $0x320] sm:$0xf]  ;;  %v3874_v45 = vld [vmem:[#allocation4 + $0x324] sm:$0xf0]  ;;  %v2823_v49 = vld [vmem:[#allocation4 + $0x210] sm:$0xf]  ;;  %v2896_v50 = vor.u32 %v3858_v43, %v2895_v41 }
  0x3b   :  { %1938 = vmatpush.bf16.msrb.mxu1 %v2928_v60  ;;  %v3023_v46 = vld [vmem:[#allocation4 + $0x3a0] sm:$0xf]  ;;  %v3890_v47 = vld [vmem:[#allocation4 + $0x3a4] sm:$0xf0]  ;;  %v2960_v51 = vor.u32 %v3874_v45, %v2959_v44  ;;  %v3840_v52 = vld [vmem:[#allocation4 + $0x214] sm:$0xf0] }
  0x3c   :  { %1952 = vmatpush.bf16.msrb.mxu2 %v2992_v61  ;;  %v2887_v53 = vld [vmem:[#allocation4 + $0x290] sm:$0xf]  ;;  %v3856_v54 = vld [vmem:[#allocation4 + $0x294] sm:$0xf0]  ;;  %v3024_v55 = vor.u32 %v3890_v47, %v3023_v46  ;;  %v2815_v61 = vld [vmem:[#allocation4 + $0x200] sm:$0xf]  ;;  %v2824_v63 = vor.u32 %v3840_v52, %v2823_v49 }
  0x3d   :  { %1966 = vmatpush.bf16.msrb.mxu3 %v3056_v2  ;;  %v2951_v56 = vld [vmem:[#allocation4 + $0x310] sm:$0xf]  ;;  %v3872_v57 = vld [vmem:[#allocation4 + $0x314] sm:$0xf0]  ;;  %v3838_v62 = vld [vmem:[#allocation4 + $0x204] sm:$0xf0]  ;;  %v2888_v5 = vor.u32 %v3856_v54, %v2887_v53 }
  0x3e   :  { %1925 = vmatpush.bf16.msrb.mxu0 %v2856_v9  ;;  %v3015_v59 = vld [vmem:[#allocation4 + $0x390] sm:$0xf]  ;;  %v3888_v60 = vld [vmem:[#allocation4 + $0x394] sm:$0xf0]  ;;  %v2879_v0 = vld [vmem:[#allocation4 + $0x280] sm:$0xf]  ;;  %v2952_v6 = vor.u32 %v3872_v57, %v2951_v56  ;;  %v2816_v19 = vor.u32 %v3838_v62, %v2815_v61 }
  0x3f   :  { %1939 = vmatpush.bf16.msrb.mxu1 %v2920_v12  ;;  %v3854_v2 = vld [vmem:[#allocation4 + $0x284] sm:$0xf0]  ;;  %v2943_v3 = vld [vmem:[#allocation4 + $0x300] sm:$0xf]  ;;  %v3127_v9 = vld [vmem:[#allocation4 + $0x470] sm:$0xf]  ;;  %v3016_v11 = vor.u32 %v3888_v60, %v3015_v59 }
  0x40   :  { %1953 = vmatpush.bf16.msrb.mxu2 %v2984_v13  ;;  %v3870_v4 = vld [vmem:[#allocation4 + $0x304] sm:$0xf0]  ;;  %v3007_v7 = vld [vmem:[#allocation4 + $0x380] sm:$0xf]  ;;  %v3916_v12 = vld [vmem:[#allocation4 + $0x474] sm:$0xf0]  ;;  %v2880_v23 = vor.u32 %v3854_v2, %v2879_v0 }
  0x41   :  { %1967 = vmatpush.bf16.msrb.mxu3 %v3048_v18  ;;  %v3886_v8 = vld [vmem:[#allocation4 + $0x384] sm:$0xf0]  ;;  %v3191_v13 = vld [vmem:[#allocation4 + $0x4f0] sm:$0xf]  ;;  %v3932_v14 = vld [vmem:[#allocation4 + $0x4f4] sm:$0xf0]  ;;  %v3128_v29 = vor.u32 %v3916_v12, %v3127_v9 }
  0x42   :  { %1926 = vmatpush.bf16.msrb.mxu0 %v2848_v24  ;;  %v3255_v15 = vld [vmem:[#allocation4 + $0x570] sm:$0xf]  ;;  %v3948_v16 = vld [vmem:[#allocation4 + $0x574] sm:$0xf0]  ;;  %v83_v21 = vld [vmem:[#allocation2 + $0x20] sm:$0xff]  ;;  %v2944_v24 = vor.u32 %v3870_v4, %v2943_v3  ;;  %v3008_v28 = vor.u32 %v3886_v8, %v3007_v7  ;;  %v3192_v33 = vor.u32 %v3932_v14, %v3191_v13 }
  0x43   :  { %1940 = vmatpush.bf16.msrb.mxu1 %v2912_v25  ;;  %v3319_v18 = vld [vmem:[#allocation4 + $0x5f0] sm:$0xf]  ;;  %v3964_v20 = vld [vmem:[#allocation4 + $0x5f4] sm:$0xf0]  ;;  %v84_v27 = vld [vmem:[#allocation2 + $0x28] sm:$0xff]  ;;  %v3256_v34 = vor.u32 %v3948_v16, %v3255_v15 }
  0x44   :  { %1954 = vmatpush.bf16.msrb.mxu2 %v2976_v26  ;;  %v101_v22 = vld [vmem:[#allocation2 + $0xb0] sm:$0xff]  ;;  %v103_v26 = vld [vmem:[#allocation2 + $0xc0] sm:$0xff]  ;;  %v86_v31 = vld [vmem:[#allocation2 + $0x38] sm:$0xff] }
  0x45   :  { %1968 = vmatpush.bf16.msrb.mxu3 %v3040_v30  ;;  %v85_v25 = vld [vmem:[#allocation2 + $0x30] sm:$0xff]  ;;  %v102_v30 = vld [vmem:[#allocation2 + $0xb8] sm:$0xff]  ;;  %v104_v32 = vld [vmem:[#allocation2 + $0xc8] sm:$0xff]  ;;  %v4258_v39 = vpack.c.bf16 %v101_v22, %v83_v21 }
  0x46   :  { %1927 = vmatpush.bf16.msrb.mxu0 %v2840_v36  ;;  %v3119_v35 = vld [vmem:[#allocation4 + $0x460] sm:$0xf]  ;;  %v3914_v36 = vld [vmem:[#allocation4 + $0x464] sm:$0xf0]  ;;  %v4260_v43 = vpack.c.bf16 %v103_v26, %v85_v25  ;;  %v4262_v44 = vpack.c.bf16 %v102_v30, %v84_v27  ;;  %v4264_v47 = vpack.c.bf16 %v104_v32, %v86_v31  ;;  %v3912_v52 = vld [vmem:[#allocation4 + $0x454] sm:$0xf0] }
  0x47   :  { %1941 = vmatpush.bf16.msrb.mxu1 %v2904_v37  ;;  %v3183_v37 = vld [vmem:[#allocation4 + $0x4e0] sm:$0xf]  ;;  %v3930_v40 = vld [vmem:[#allocation4 + $0x4e4] sm:$0xf0]  ;;  %v3175_v53 = vld [vmem:[#allocation4 + $0x4d0] sm:$0xf] }
  0x48   :  { %1955 = vmatpush.bf16.msrb.mxu2 %v2968_v38  ;;  %v3320_v38 = vor.u32 %v3964_v20, %v3319_v18  ;;  %v3247_v41 = vld [vmem:[#allocation4 + $0x560] sm:$0xf]  ;;  %v3962_v46 = vld [vmem:[#allocation4 + $0x5e4] sm:$0xf0]  ;;  %v3184_v49 = vor.u32 %v3930_v40, %v3183_v37  ;;  %v3239_v56 = vld [vmem:[#allocation4 + $0x550] sm:$0xf] }
  0x49   :  { %1969 = vmatpush.bf16.msrb.mxu3 %v3032_v42  ;;  %v3946_v42 = vld [vmem:[#allocation4 + $0x564] sm:$0xf0]  ;;  %v3311_v45 = vld [vmem:[#allocation4 + $0x5e0] sm:$0xf]  ;;  %v3944_v57 = vld [vmem:[#allocation4 + $0x554] sm:$0xf0] }
  0x4a   :  { %1928 = vmatpush.bf16.msrb.mxu0 %v2832_v48  ;;  %v3120_v48 = vor.u32 %v3914_v36, %v3119_v35  ;;  %v3312_v54 = vor.u32 %v3962_v46, %v3311_v45  ;;  %v3303_v59 = vld [vmem:[#allocation4 + $0x5d0] sm:$0xf]  ;;  %v3960_v60 = vld [vmem:[#allocation4 + $0x5d4] sm:$0xf0]  ;;  %v3103_v0 = vld [vmem:[#allocation4 + $0x440] sm:$0xf] }
  0x4b   :  { %1942 = vmatpush.bf16.msrb.mxu1 %v2896_v50  ;;  %v3248_v50 = vor.u32 %v3946_v42, %v3247_v41  ;;  %v3910_v2 = vld [vmem:[#allocation4 + $0x444] sm:$0xf0]  ;;  %v3167_v3 = vld [vmem:[#allocation4 + $0x4c0] sm:$0xf]  ;;  %v3304_v4 = vor.u32 %v3960_v60, %v3303_v59  ;;  %v3095_v14 = vld [vmem:[#allocation4 + $0x430] sm:$0xf] }
  0x4c   :  { %1956 = vmatpush.bf16.msrb.mxu2 %v2960_v51  ;;  %v3111_v51 = vld [vmem:[#allocation4 + $0x450] sm:$0xf]  ;;  %v3942_v7 = vld [vmem:[#allocation4 + $0x544] sm:$0xf0]  ;;  %v3295_v8 = vld [vmem:[#allocation4 + $0x5c0] sm:$0xf] }
  0x4d   :  { %1970 = vmatpush.bf16.msrb.mxu3 %v3024_v55  ;;  %v3928_v55 = vld [vmem:[#allocation4 + $0x4d4] sm:$0xf0]  ;;  %v3112_v61 = vor.u32 %v3912_v52, %v3111_v51  ;;  %v3958_v9 = vld [vmem:[#allocation4 + $0x5c4] sm:$0xf0]  ;;  %v3159_v16 = vld [vmem:[#allocation4 + $0x4b0] sm:$0xf] }
  0x4e   :  { %1929 = vmatpush.bf16.msrb.mxu0 %v2824_v63  ;;  %v3176_v62 = vor.u32 %v3928_v55, %v3175_v53  ;;  %v3240_v63 = vor.u32 %v3944_v57, %v3239_v56  ;;  %v3908_v15 = vld [vmem:[#allocation4 + $0x434] sm:$0xf0]  ;;  %v3296_v18 = vor.u32 %v3958_v9, %v3295_v8  ;;  %v3223_v20 = vld [vmem:[#allocation4 + $0x530] sm:$0xf]  ;;  %v3087_v27 = vld [vmem:[#allocation4 + $0x420] sm:$0xf] }
  0x4f   :  { %1943 = vmatpush.bf16.msrb.mxu1 %v2888_v5  ;;  %v3926_v5 = vld [vmem:[#allocation4 + $0x4c4] sm:$0xf0]  ;;  %v3940_v21 = vld [vmem:[#allocation4 + $0x534] sm:$0xf0]  ;;  %v3287_v22 = vld [vmem:[#allocation4 + $0x5b0] sm:$0xf] }
  0x50   :  { %1957 = vmatpush.bf16.msrb.mxu2 %v2952_v6  ;;  %v3231_v6 = vld [vmem:[#allocation4 + $0x540] sm:$0xf]  ;;  %v3168_v12 = vor.u32 %v3926_v5, %v3167_v3  ;;  %v3224_v26 = vor.u32 %v3940_v21, %v3223_v20  ;;  %v3922_v31 = vld [vmem:[#allocation4 + $0x4a4] sm:$0xf0]  ;;  %v3079_v37 = vld [vmem:[#allocation4 + $0x410] sm:$0xf] }
  0x51   :  { %1971 = vmatpush.bf16.msrb.mxu3 %v3016_v11  ;;  %v3104_v11 = vor.u32 %v3910_v2, %v3103_v0  ;;  %v3232_v13 = vor.u32 %v3942_v7, %v3231_v6  ;;  %v3215_v32 = vld [vmem:[#allocation4 + $0x520] sm:$0xf]  ;;  %v3954_v35 = vld [vmem:[#allocation4 + $0x5a4] sm:$0xf0]  ;;  %v3904_v41 = vld [vmem:[#allocation4 + $0x414] sm:$0xf0] }
  0x52   :  { %1930 = vmatpush.bf16.msrb.mxu0 %v2816_v19  ;;  %v3924_v19 = vld [vmem:[#allocation4 + $0x4b4] sm:$0xf0]  ;;  %v3143_v42 = vld [vmem:[#allocation4 + $0x490] sm:$0xf]  ;;  %v3071_v52 = vld [vmem:[#allocation4 + $0x400] sm:$0xf] }
  0x53   :  { %1944 = vmatpush.bf16.msrb.mxu1 %v2880_v23  ;;  %v3956_v23 = vld [vmem:[#allocation4 + $0x5b4] sm:$0xf0]  ;;  %v3160_v25 = vor.u32 %v3924_v19, %v3159_v16  ;;  %v3902_v53 = vld [vmem:[#allocation4 + $0x404] sm:$0xf0]  ;;  %v3135_v55 = vld [vmem:[#allocation4 + $0x480] sm:$0xf] }
  0x54   :  { %1958 = vmatpush.bf16.msrb.mxu2 %v2944_v24  ;;  %v3096_v24 = vor.u32 %v3908_v15, %v3095_v14  ;;  %v3288_v30 = vor.u32 %v3956_v23, %v3287_v22  ;;  %v3920_v45 = vld [vmem:[#allocation4 + $0x494] sm:$0xf0]  ;;  %v3918_v56 = vld [vmem:[#allocation4 + $0x484] sm:$0xf0]  ;;  %v3199_v57 = vld [vmem:[#allocation4 + $0x500] sm:$0xf]  ;;  %v3072_v9 = vor.u32 %v3902_v53, %v3071_v52 }
  0x55   :  { %1972 = vmatpush.bf16.msrb.mxu3 %v3008_v28  ;;  %1931 = vmatmul.bf16.vlgmr.msrb.gmra.mxu0 %v4258_v39  ;;  %v3906_v28 = vld [vmem:[#allocation4 + $0x424] sm:$0xf0]  ;;  %v3952_v51 = vld [vmem:[#allocation4 + $0x594] sm:$0xf0]  ;;  %v3144_v60 = vor.u32 %v3920_v45, %v3143_v42  ;;  %v3383_v0 = vld [vmem:[#allocation4 + $0x670] sm:$0xf]  ;;  %v3136_v14 = vor.u32 %v3918_v56, %v3135_v55 }
  0x56   :  { %1979 = vmatpush.bf16.msra.mxu0 %v3128_v29  ;;  %1945 = vmatmul.bf16.vlgmr.msrb.gmra.mxu1 %v4262_v44  ;;  %v3151_v29 = vld [vmem:[#allocation4 + $0x4a0] sm:$0xf]  ;;  %v3088_v36 = vor.u32 %v3906_v28, %v3087_v27  ;;  %v3934_v59 = vld [vmem:[#allocation4 + $0x504] sm:$0xf0]  ;;  %v3980_v3 = vld [vmem:[#allocation4 + $0x674] sm:$0xf0] }
  0x57   :  { %1993 = vmatpush.bf16.msra.mxu1 %v3192_v33  ;;  %1959 = vmatmul.bf16.vlgmr.msrb.gmra.mxu2 %v4260_v43  ;;  %v3938_v33 = vld [vmem:[#allocation4 + $0x524] sm:$0xf0]  ;;  %v3996_v5 = vld [vmem:[#allocation4 + $0x6f4] sm:$0xf0]  ;;  %v3511_v6 = vld [vmem:[#allocation4 + $0x770] sm:$0xf]  ;;  %v3200_v15 = vor.u32 %v3934_v59, %v3199_v57  ;;  %v3384_v21 = vor.u32 %v3980_v3, %v3383_v0 }
  0x58   :  { %2007 = vmatpush.bf16.msra.mxu2 %v3256_v34  ;;  %1973 = vmatmul.bf16.vlgmr.msrb.gmra.mxu3 %v4264_v47  ;;  %v3279_v34 = vld [vmem:[#allocation4 + $0x5a0] sm:$0xf]  ;;  %v3216_v40 = vor.u32 %v3938_v33, %v3215_v32  ;;  %v4012_v7 = vld [vmem:[#allocation4 + $0x774] sm:$0xf0]  ;;  %v3575_v8 = vld [vmem:[#allocation4 + $0x7f0] sm:$0xf] }
  0x59   :  { %2021 = vmatpush.bf16.msra.mxu3 %v3320_v38  ;;  %v3152_v38 = vor.u32 %v3922_v31, %v3151_v29  ;;  %v3280_v46 = vor.u32 %v3954_v35, %v3279_v34  ;;  %v89_v16 = vld [vmem:[#allocation2 + $0x50] sm:$0xff]  ;;  %v88_v19 = vld [vmem:[#allocation2 + $0x48] sm:$0xff]  ;;  %v106_v22 = vld [vmem:[#allocation2 + $0xd8] sm:$0xff] }
  0x5a   :  { %1980 = vmatpush.bf16.msra.mxu0 %v3120_v48  ;;  %v3207_v48 = vld [vmem:[#allocation4 + $0x510] sm:$0xf]  ;;  %v90_v23 = vld [vmem:[#allocation2 + $0x58] sm:$0xff]  ;;  %v3375_v27 = vld [vmem:[#allocation4 + $0x660] sm:$0xf] }
  0x5b   :  { %1994 = vmatpush.bf16.msra.mxu1 %v3184_v49  ;;  %v3936_v49 = vld [vmem:[#allocation4 + $0x514] sm:$0xf0]  ;;  %v3978_v28 = vld [vmem:[#allocation4 + $0x664] sm:$0xf0]  ;;  %v3439_v29 = vld [vmem:[#allocation4 + $0x6e0] sm:$0xf] }
  0x5c   :  { %2008 = vmatpush.bf16.msra.mxu2 %v3248_v50  ;;  %v3271_v50 = vld [vmem:[#allocation4 + $0x590] sm:$0xf]  ;;  %v3994_v32 = vld [vmem:[#allocation4 + $0x6e4] sm:$0xf0]  ;;  %v3503_v33 = vld [vmem:[#allocation4 + $0x760] sm:$0xf] }
  0x5d   :  { %2022 = vmatpush.bf16.msra.mxu3 %v3312_v54  ;;  %v3080_v54 = vor.u32 %v3904_v41, %v3079_v37  ;;  %v3272_v2 = vor.u32 %v3952_v51, %v3271_v50  ;;  %v4010_v34 = vld [vmem:[#allocation4 + $0x764] sm:$0xf0]  ;;  %v3567_v37 = vld [vmem:[#allocation4 + $0x7e0] sm:$0xf]  ;;  %v3376_v41 = vor.u32 %v3978_v28, %v3375_v27  ;;  %v3440_v42 = vor.u32 %v3994_v32, %v3439_v29  ;;  %v3992_v51 = vld [vmem:[#allocation4 + $0x6d4] sm:$0xf0] }
  0x5e   :  { %1981 = vmatpush.bf16.msra.mxu0 %v3112_v61  ;;  %v3208_v61 = vor.u32 %v3936_v49, %v3207_v48  ;;  %v3504_v45 = vor.u32 %v4010_v34, %v3503_v33  ;;  %v3976_v48 = vld [vmem:[#allocation4 + $0x654] sm:$0xf0]  ;;  %v3431_v49 = vld [vmem:[#allocation4 + $0x6d0] sm:$0xf]  ;;  %v3990_v0 = vld [vmem:[#allocation4 + $0x6c4] sm:$0xf0] }
  0x5f   :  { %1995 = vmatpush.bf16.msra.mxu1 %v3176_v62  ;;  %v3263_v62 = vld [vmem:[#allocation4 + $0x580] sm:$0xf]  ;;  %v3495_v52 = vld [vmem:[#allocation4 + $0x750] sm:$0xf]  ;;  %v4008_v53 = vld [vmem:[#allocation4 + $0x754] sm:$0xf0]  ;;  %v3432_v57 = vor.u32 %v3992_v51, %v3431_v49 }
  0x60   :  { %2009 = vmatpush.bf16.msra.mxu2 %v3240_v63  ;;  %v3950_v63 = vld [vmem:[#allocation4 + $0x584] sm:$0xf0]  ;;  %v4024_v55 = vld [vmem:[#allocation4 + $0x7d4] sm:$0xf0]  ;;  %v3496_v59 = vor.u32 %v4008_v53, %v3495_v52  ;;  %v3471_v28 = vld [vmem:[#allocation4 + $0x720] sm:$0xf] }
  0x61   :  { %2023 = vmatpush.bf16.msra.mxu3 %v3304_v4  ;;  %v3447_v4 = vld [vmem:[#allocation4 + $0x6f0] sm:$0xf]  ;;  %v3264_v20 = vor.u32 %v3950_v63, %v3263_v62  ;;  %v3423_v62 = vld [vmem:[#allocation4 + $0x6c0] sm:$0xf]  ;;  %v4006_v3 = vld [vmem:[#allocation4 + $0x744] sm:$0xf0] }
  0x62   :  { %1982 = vmatpush.bf16.msra.mxu0 %v3104_v11  ;;  %v4028_v11 = vld [vmem:[#allocation4 + $0x7f4] sm:$0xf0]  ;;  %v3986_v27 = vld [vmem:[#allocation4 + $0x6a4] sm:$0xf0]  ;;  %v3335_v34 = vld [vmem:[#allocation4 + $0x610] sm:$0xf] }
  0x63   :  { %1996 = vmatpush.bf16.msra.mxu1 %v3168_v12  ;;  %v87_v12 = vld [vmem:[#allocation2 + $0x40] sm:$0xff]  ;;  %v4002_v29 = vld [vmem:[#allocation4 + $0x724] sm:$0xf0]  ;;  %v4000_v49 = vld [vmem:[#allocation4 + $0x714] sm:$0xf0] }
  0x64   :  { %2010 = vmatpush.bf16.msra.mxu2 %v3232_v13  ;;  %v105_v13 = vld [vmem:[#allocation2 + $0xd0] sm:$0xff]  ;;  %v4018_v32 = vld [vmem:[#allocation4 + $0x7a4] sm:$0xf0]  ;;  %v4016_v51 = vld [vmem:[#allocation4 + $0x794] sm:$0xf0] }
  0x65   :  { %2024 = vmatpush.bf16.msra.mxu3 %v3296_v18  ;;  %v107_v18 = vld [vmem:[#allocation2 + $0xe0] sm:$0xff]  ;;  %v4270_v31 = vpack.c.bf16 %v105_v13, %v87_v12  ;;  %v3415_v12 = vld [vmem:[#allocation4 + $0x6b0] sm:$0xf]  ;;  %v3966_v53 = vld [vmem:[#allocation4 + $0x604] sm:$0xf0] }
  0x66   :  { %1983 = vmatpush.bf16.msra.mxu0 %v3096_v24  ;;  %v108_v24 = vld [vmem:[#allocation2 + $0xe8] sm:$0xff]  ;;  %v4272_v35 = vpack.c.bf16 %v107_v18, %v89_v16  ;;  %v4004_v16 = vld [vmem:[#allocation4 + $0x734] sm:$0xf0]  ;;  %v3543_v18 = vld [vmem:[#allocation4 + $0x7b0] sm:$0xf] }
  0x67   :  { %1997 = vmatpush.bf16.msra.mxu1 %v3160_v25  ;;  %v3448_v25 = vor.u32 %v3996_v5, %v3447_v4  ;;  %v3551_v4 = vld [vmem:[#allocation4 + $0x7c0] sm:$0xf]  ;;  %v4022_v5 = vld [vmem:[#allocation4 + $0x7c4] sm:$0xf0] }
  0x68   :  { %2011 = vmatpush.bf16.msra.mxu2 %v3224_v26  ;;  %v3512_v26 = vor.u32 %v4012_v7, %v3511_v6  ;;  %v3424_v7 = vor.u32 %v3990_v0, %v3423_v62  ;;  %v3552_v13 = vor.u32 %v4022_v5, %v3551_v4  ;;  %v3327_v52 = vld [vmem:[#allocation4 + $0x600] sm:$0xf]  ;;  %v3639_v0 = vld [vmem:[#allocation4 + $0x870] sm:$0xf]  ;;  %v4060_v5 = vld [vmem:[#allocation4 + $0x8f4] sm:$0xf0] }
  0x69   :  { %2025 = vmatpush.bf16.msra.mxu3 %v3288_v30  ;;  %v3576_v30 = vor.u32 %v4028_v11, %v3575_v8  ;;  %v3972_v11 = vld [vmem:[#allocation4 + $0x634] sm:$0xf0]  ;;  %v3519_v62 = vld [vmem:[#allocation4 + $0x780] sm:$0xf]  ;;  %v3703_v4 = vld [vmem:[#allocation4 + $0x8f0] sm:$0xf] }
  0x6a   :  { %1984 = vmatpush.bf16.msra.mxu0 %v3088_v36  ;;  %v4274_v36 = vpack.c.bf16 %v106_v22, %v88_v19  ;;  %v4020_v19 = vld [vmem:[#allocation4 + $0x7b4] sm:$0xf0] }
  0x6b   :  { %1998 = vmatpush.bf16.msra.mxu1 %v3152_v38  ;;  %v4026_v38 = vld [vmem:[#allocation4 + $0x7e4] sm:$0xf0] }
  0x6c   :  { %2012 = vmatpush.bf16.msra.mxu2 %v3216_v40  ;;  %v4276_v40 = vpack.c.bf16 %v108_v24, %v90_v23  ;;  %v3568_v50 = vor.u32 %v4026_v38, %v3567_v37  ;;  %v3343_v23 = vld [vmem:[#allocation4 + $0x620] sm:$0xf]  ;;  %v3970_v24 = vld [vmem:[#allocation4 + $0x624] sm:$0xf0]  ;;  %v3968_v37 = vld [vmem:[#allocation4 + $0x614] sm:$0xf0] }
  0x6d   :  { %2026 = vmatpush.bf16.msra.mxu3 %v3280_v46  ;;  %v3367_v46 = vld [vmem:[#allocation4 + $0x650] sm:$0xf]  ;;  %v3344_v33 = vor.u32 %v3970_v24, %v3343_v23  ;;  %v94_v23 = vld [vmem:[#allocation2 + $0x78] sm:$0xff]  ;;  %v112_v24 = vld [vmem:[#allocation2 + $0x108] sm:$0xff] }
  0x6e   :  { %1985 = vmatpush.bf16.msra.mxu0 %v3080_v54  ;;  %v3559_v54 = vld [vmem:[#allocation4 + $0x7d0] sm:$0xf]  ;;  %v3368_v56 = vor.u32 %v3976_v48, %v3367_v46 }
  0x6f   :  { %1999 = vmatpush.bf16.msra.mxu1 %v3144_v60  ;;  %v3359_v60 = vld [vmem:[#allocation4 + $0x640] sm:$0xf]  ;;  %v3560_v63 = vor.u32 %v4024_v55, %v3559_v54  ;;  %v3463_v46 = vld [vmem:[#allocation4 + $0x710] sm:$0xf]  ;;  %v3336_v54 = vor.u32 %v3968_v37, %v3335_v34  ;;  %v3785_v34 = vld [vmem:[#allocation4 + $0x64] sm:$0xf] }
  0x70   :  { %2013 = vmatpush.bf16.msra.mxu2 %v3208_v61  ;;  %v3974_v61 = vld [vmem:[#allocation4 + $0x644] sm:$0xf0]  ;;  %v3391_v55 = vld [vmem:[#allocation4 + $0x680] sm:$0xf]  ;;  %v2609_v37 = vld [vmem:[#allocation4 + $0x68] sm:$0xf0] }
  0x71   :  { %2027 = vmatpush.bf16.msra.mxu3 %v3272_v2  ;;  %v3487_v2 = vld [vmem:[#allocation4 + $0x740] sm:$0xf]  ;;  %v3360_v6 = vor.u32 %v3974_v61, %v3359_v60  ;;  %v3464_v61 = vor.u32 %v4000_v49, %v3463_v46  ;;  %v4288_v46 = vpack.c.bf16 %v112_v24, %v94_v23  ;;  %v2649_v23 = vld [vmem:[#allocation4 + $0xb8] sm:$0xf0] }
  0x72   :  { %1986 = vmatpush.bf16.msra.mxu0 %v3072_v9  ;;  %v3488_v8 = vor.u32 %v4006_v3, %v3487_v2  ;;  %v3351_v9 = vld [vmem:[#allocation4 + $0x630] sm:$0xf]  ;;  %v4044_v3 = vld [vmem:[#allocation4 + $0x874] sm:$0xf0] }
  0x73   :  { %2000 = vmatpush.bf16.msra.mxu1 %v3136_v14  ;;  %v3988_v14 = vld [vmem:[#allocation4 + $0x6b4] sm:$0xf0] }
  0x74   :  { %2014 = vmatpush.bf16.msra.mxu2 %v3200_v15  ;;  %v3479_v15 = vld [vmem:[#allocation4 + $0x730] sm:$0xf] }
  0x75   :  { %2028 = vmatpush.bf16.msra.mxu3 %v3264_v20  ;;  %1987 = vmatmul.bf16.vlgmr.msra.gmra.mxu0 %v4270_v31  ;;  %v3352_v20 = vor.u32 %v3972_v11, %v3351_v9  ;;  %v3480_v22 = vor.u32 %v4004_v16, %v3479_v15  ;;  %v3328_v9 = vor.u32 %v3966_v53, %v3327_v52  ;;  %v2681_v11 = vld [vmem:[#allocation4 + $0xf8] sm:$0xf0]  ;;  %v93_v16 = vld [vmem:[#allocation2 + $0x70] sm:$0xff]  ;;  %v4040_v52 = vld [vmem:[#allocation4 + $0x854] sm:$0xf0] }
  0x76   :  { %2035 = vmatpush.bf16.msrb.mxu0 %v3384_v21  ;;  %2001 = vmatmul.bf16.vlgmr.msra.gmra.mxu1 %v4274_v36  ;;  %v3416_v21 = vor.u32 %v3988_v14, %v3415_v12  ;;  %v91_v12 = vld [vmem:[#allocation2 + $0x60] sm:$0xff]  ;;  %v3687_v53 = vld [vmem:[#allocation4 + $0x8d0] sm:$0xf] }
  0x77   :  { %2049 = vmatpush.bf16.msrb.mxu1 %v3448_v25  ;;  %2015 = vmatmul.bf16.vlgmr.msra.gmra.mxu2 %v4272_v35  ;;  %v3407_v25 = vld [vmem:[#allocation4 + $0x6a0] sm:$0xf] }
  0x78   :  { %2063 = vmatpush.bf16.msrb.mxu2 %v3512_v26  ;;  %2029 = vmatmul.bf16.vlgmr.msra.gmra.mxu3 %v4276_v40  ;;  %v3544_v26 = vor.u32 %v4020_v19, %v3543_v18  ;;  %v3408_v38 = vor.u32 %v3986_v27, %v3407_v25  ;;  %v111_v18 = vld [vmem:[#allocation2 + $0x100] sm:$0xff]  ;;  %v92_v19 = vld [vmem:[#allocation2 + $0x68] sm:$0xff]  ;;  %v3704_v25 = vor.u32 %v4060_v5, %v3703_v4 }
  0x79   :  { %2077 = vmatpush.bf16.msrb.mxu3 %v3576_v30  ;;  %v3535_v30 = vld [vmem:[#allocation4 + $0x7a0] sm:$0xf]  ;;  %v4054_v5 = vld [vmem:[#allocation4 + $0x8c4] sm:$0xf0] }
  0x7a   :  { %2036 = vmatpush.bf16.msrb.mxu0 %v3376_v41  ;;  %v3472_v41 = vor.u32 %v4002_v29, %v3471_v28  ;;  %v3536_v48 = vor.u32 %v4018_v32, %v3535_v30  ;;  %v3631_v27 = vld [vmem:[#allocation4 + $0x860] sm:$0xf]  ;;  %v4042_v28 = vld [vmem:[#allocation4 + $0x864] sm:$0xf0] }
  0x7b   :  { %2050 = vmatpush.bf16.msrb.mxu1 %v3440_v42  ;;  %v3399_v42 = vld [vmem:[#allocation4 + $0x690] sm:$0xf]  ;;  %v3695_v29 = vld [vmem:[#allocation4 + $0x8e0] sm:$0xf] }
  0x7c   :  { %2064 = vmatpush.bf16.msrb.mxu2 %v3504_v45  ;;  %v3984_v45 = vld [vmem:[#allocation4 + $0x694] sm:$0xf0] }
  0x7d   :  { %2078 = vmatpush.bf16.msrb.mxu3 %v3568_v50  ;;  %v3527_v50 = vld [vmem:[#allocation4 + $0x790] sm:$0xf]  ;;  %v3400_v60 = vor.u32 %v3984_v45, %v3399_v42  ;;  %v3801_v42 = vld [vmem:[#allocation4 + $0xe4] sm:$0xf]  ;;  %v2673_v45 = vld [vmem:[#allocation4 + $0xe8] sm:$0xf0] }
  0x7e   :  { %2037 = vmatpush.bf16.msrb.mxu0 %v3368_v56  ;;  %v3982_v56 = vld [vmem:[#allocation4 + $0x684] sm:$0xf0]  ;;  %v3528_v2 = vor.u32 %v4016_v51, %v3527_v50  ;;  %v2612_v50 = vor.u32 %v3785_v34, %v2609_v37  ;;  %v3623_v51 = vld [vmem:[#allocation4 + $0x850] sm:$0xf]  ;;  %v3777_v34 = vld [vmem:[#allocation4 + $0x24] sm:$0xf] }
  0x7f   :  { %2051 = vmatpush.bf16.msrb.mxu1 %v3432_v57  ;;  %v3455_v57 = vld [vmem:[#allocation4 + $0x700] sm:$0xf]  ;;  %v3392_v14 = vor.u32 %v3982_v56, %v3391_v55  ;;  %v4056_v55 = vld [vmem:[#allocation4 + $0x8d4] sm:$0xf0]  ;;  %v3783_v56 = vld [vmem:[#allocation4 + $0x54] sm:$0xf] }
  0x80   :  { %2065 = vmatpush.bf16.msrb.mxu2 %v3496_v59  ;;  %v3998_v59 = vld [vmem:[#allocation4 + $0x704] sm:$0xf0]  ;;  %v2577_v37 = vld [vmem:[#allocation4 + $0x28] sm:$0xf0] }
  0x81   :  { %2079 = vmatpush.bf16.msrb.mxu3 %v3560_v63  ;;  %v4014_v63 = vld [vmem:[#allocation4 + $0x784] sm:$0xf0]  ;;  %v3456_v15 = vor.u32 %v3998_v59, %v3455_v57  ;;  %v2601_v57 = vld [vmem:[#allocation4 + $0x58] sm:$0xf0]  ;;  %v3799_v59 = vld [vmem:[#allocation4 + $0xd4] sm:$0xf] }
  0x82   :  { %2038 = vmatpush.bf16.msrb.mxu0 %v3360_v6  ;;  %v3787_v6 = vld [vmem:[#allocation4 + $0x74] sm:$0xf] }
  0x83   :  { %2052 = vmatpush.bf16.msrb.mxu1 %v3424_v7  ;;  %v2617_v7 = vld [vmem:[#allocation4 + $0x78] sm:$0xf0] }
  0x84   :  { %2066 = vmatpush.bf16.msrb.mxu2 %v3488_v8  ;;  %v3803_v8 = vld [vmem:[#allocation4 + $0xf4] sm:$0xf] }
  0x85   :  { %2080 = vmatpush.bf16.msrb.mxu3 %v3552_v13  ;;  %v109_v13 = vld [vmem:[#allocation2 + $0xf0] sm:$0xff]  ;;  %v2684_v30 = vor.u32 %v3803_v8, %v2681_v11  ;;  %v3797_v8 = vld [vmem:[#allocation4 + $0xc4] sm:$0xf] }
  0x86   :  { %2039 = vmatpush.bf16.msrb.mxu0 %v3352_v20  ;;  %v3520_v20 = vor.u32 %v4014_v63, %v3519_v62  ;;  %v4282_v32 = vpack.c.bf16 %v109_v13, %v91_v12  ;;  %v3688_v62 = vor.u32 %v4056_v55, %v3687_v53  ;;  %v2604_v63 = vor.u32 %v3783_v56, %v2601_v57  ;;  %v3655_v53 = vld [vmem:[#allocation4 + $0x890] sm:$0xf]  ;;  %v4048_v55 = vld [vmem:[#allocation4 + $0x894] sm:$0xf0]  ;;  %v3775_v56 = vld [vmem:[#allocation4 + $0x14] sm:$0xf] }
  0x87   :  { %2053 = vmatpush.bf16.msrb.mxu1 %v3416_v21  ;;  %v3640_v21 = vor.u32 %v4044_v3, %v3639_v0  ;;  %v3615_v0 = vld [vmem:[#allocation4 + $0x840] sm:$0xf]  ;;  %v2569_v57 = vld [vmem:[#allocation4 + $0x18] sm:$0xf0] }
  0x88   :  { %2067 = vmatpush.bf16.msrb.mxu2 %v3480_v22  ;;  %v110_v22 = vld [vmem:[#allocation2 + $0xf8] sm:$0xff]  ;;  %v3679_v3 = vld [vmem:[#allocation4 + $0x8c0] sm:$0xf] }
  0x89   :  { %2081 = vmatpush.bf16.msrb.mxu3 %v3544_v26  ;;  %v2620_v26 = vor.u32 %v3787_v6, %v2617_v7  ;;  %v3781_v6 = vld [vmem:[#allocation4 + $0x44] sm:$0xf]  ;;  %v2593_v7 = vld [vmem:[#allocation4 + $0x48] sm:$0xf0]  ;;  %v3680_v12 = vor.u32 %v4054_v5, %v3679_v3  ;;  %v2572_v3 = vor.u32 %v3775_v56, %v2569_v57  ;;  %v3815_v57 = vld [vmem:[#allocation4 + $0x154] sm:$0xf] }
  0x8a   :  { %2040 = vmatpush.bf16.msrb.mxu0 %v3344_v33  ;;  %v4058_v33 = vld [vmem:[#allocation4 + $0x8e4] sm:$0xf0]  ;;  %v2596_v13 = vor.u32 %v3781_v6, %v2593_v7  ;;  %v3773_v5 = vld [vmem:[#allocation4 + $0x4] sm:$0xf]  ;;  %v2561_v6 = vld [vmem:[#allocation4 + $0x8] sm:$0xf0] }
  0x8b   :  { %2054 = vmatpush.bf16.msrb.mxu1 %v3408_v38  ;;  %v4284_v38 = vpack.c.bf16 %v111_v18, %v93_v16  ;;  %v3696_v49 = vor.u32 %v4058_v33, %v3695_v29  ;;  %v3671_v16 = vld [vmem:[#allocation4 + $0x8b0] sm:$0xf]  ;;  %v3663_v29 = vld [vmem:[#allocation4 + $0x8a0] sm:$0xf]  ;;  %v4050_v33 = vld [vmem:[#allocation4 + $0x8a4] sm:$0xf0] }
  0x8c   :  { %2068 = vmatpush.bf16.msrb.mxu2 %v3472_v41  ;;  %v4286_v41 = vpack.c.bf16 %v110_v22, %v92_v19  ;;  %v4052_v19 = vld [vmem:[#allocation4 + $0x8b4] sm:$0xf0]  ;;  %v3795_v22 = vld [vmem:[#allocation4 + $0xb4] sm:$0xf] }
  0x8d   :  { %2082 = vmatpush.bf16.msrb.mxu3 %v3536_v48  ;;  %v3632_v48 = vor.u32 %v4042_v28, %v3631_v27  ;;  %v3599_v27 = vld [vmem:[#allocation4 + $0x820] sm:$0xf]  ;;  %v4034_v28 = vld [vmem:[#allocation4 + $0x824] sm:$0xf0] }
  0x8e   :  { %2041 = vmatpush.bf16.msrb.mxu0 %v3336_v54  ;;  %v2676_v54 = vor.u32 %v3801_v42, %v2673_v45  ;;  %v3793_v42 = vld [vmem:[#allocation4 + $0xa4] sm:$0xf]  ;;  %v2641_v45 = vld [vmem:[#allocation4 + $0xa8] sm:$0xf0] }
  0x8f   :  { %2055 = vmatpush.bf16.msrb.mxu1 %v3400_v60  ;;  %v2665_v60 = vld [vmem:[#allocation4 + $0xd8] sm:$0xf0] }
  0x90   :  { %2069 = vmatpush.bf16.msrb.mxu2 %v3464_v61  ;;  %v3624_v61 = vor.u32 %v4040_v52, %v3623_v51  ;;  %v2668_v4 = vor.u32 %v3799_v59, %v2665_v60  ;;  %v3591_v51 = vld [vmem:[#allocation4 + $0x810] sm:$0xf]  ;;  %v4032_v52 = vld [vmem:[#allocation4 + $0x814] sm:$0xf0]  ;;  %v3791_v59 = vld [vmem:[#allocation4 + $0x94] sm:$0xf] }
  0x91   :  { %2083 = vmatpush.bf16.msrb.mxu3 %v3528_v2  ;;  %v4038_v2 = vld [vmem:[#allocation4 + $0x844] sm:$0xf0]  ;;  %v2633_v60 = vld [vmem:[#allocation4 + $0x98] sm:$0xf0] }
  0x92   :  { %2042 = vmatpush.bf16.msrb.mxu0 %v3328_v9  ;;  %v2657_v9 = vld [vmem:[#allocation4 + $0xc8] sm:$0xf0]  ;;  %v3616_v11 = vor.u32 %v4038_v2, %v3615_v0  ;;  %v3647_v0 = vld [vmem:[#allocation4 + $0x880] sm:$0xf]  ;;  %v3656_v2 = vor.u32 %v4048_v55, %v3655_v53  ;;  %v2636_v7 = vor.u32 %v3791_v59, %v2633_v60  ;;  %v2729_v59 = vld [vmem:[#allocation4 + $0x158] sm:$0xf0] }
  0x93   :  { %2056 = vmatpush.bf16.msrb.mxu1 %v3392_v14  ;;  %v3607_v14 = vld [vmem:[#allocation4 + $0x830] sm:$0xf]  ;;  %v2660_v18 = vor.u32 %v3797_v8, %v2657_v9  ;;  %v3789_v8 = vld [vmem:[#allocation4 + $0x84] sm:$0xf]  ;;  %v2625_v9 = vld [vmem:[#allocation4 + $0x88] sm:$0xf0] }
  0x94   :  { %2070 = vmatpush.bf16.msrb.mxu2 %v3456_v15  ;;  %v4036_v15 = vld [vmem:[#allocation4 + $0x834] sm:$0xf0]  ;;  %v2929_v53 = vld [vmem:[#allocation4 + $0x2e8] sm:$0xf0]  ;;  %v3831_v60 = vld [vmem:[#allocation4 + $0x1d4] sm:$0xf] }
  0x95   :  { %2084 = vmatpush.bf16.msrb.mxu3 %v3520_v20  ;;  %2043 = vmatmul.bf16.vlgmr.msrb.gmra.mxu0 %v4282_v32  ;;  %v3779_v20 = vld [vmem:[#allocation4 + $0x34] sm:$0xf]  ;;  %v3608_v24 = vor.u32 %v4036_v15, %v3607_v14  ;;  %v2809_v14 = vld [vmem:[#allocation4 + $0x1f8] sm:$0xf0] }
  0x96   :  { %2091 = vmatpush.bf16.msra.mxu0 %v3640_v21  ;;  %2057 = vmatmul.bf16.vlgmr.msrb.gmra.mxu1 %v4286_v41  ;;  %v2585_v21 = vld [vmem:[#allocation4 + $0x38] sm:$0xf0] }
  0x97   :  { %2105 = vmatpush.bf16.msra.mxu1 %v3704_v25  ;;  %2071 = vmatmul.bf16.vlgmr.msrb.gmra.mxu2 %v4284_v38  ;;  %v3672_v25 = vor.u32 %v4052_v19, %v3671_v16  ;;  %v3851_v16 = vld [vmem:[#allocation4 + $0x274] sm:$0xf] }
  0x98   :  { %2119 = vmatpush.bf16.msra.mxu2 %v2620_v26  ;;  %2085 = vmatmul.bf16.vlgmr.msrb.gmra.mxu3 %v4288_v46  ;;  %v2588_v26 = vor.u32 %v3779_v20, %v2585_v21  ;;  %v3867_v19 = vld [vmem:[#allocation4 + $0x2f4] sm:$0xf]  ;;  %v2564_v21 = vor.u32 %v3773_v5, %v2561_v6 }
  0x99   :  { %2133 = vmatpush.bf16.msra.mxu3 %v2684_v30  ;;  %v2652_v30 = vor.u32 %v3795_v22, %v2649_v23  ;;  %v2937_v22 = vld [vmem:[#allocation4 + $0x2f8] sm:$0xf0]  ;;  %v95_v23 = vld [vmem:[#allocation2 + $0x80] sm:$0xff] }
  0x9a   :  { %2092 = vmatpush.bf16.msra.mxu0 %v3632_v48  ;;  %v3600_v48 = vor.u32 %v4034_v28, %v3599_v27  ;;  %v96_v27 = vld [vmem:[#allocation2 + $0x88] sm:$0xff]  ;;  %v114_v28 = vld [vmem:[#allocation2 + $0x118] sm:$0xff] }
  0x9b   :  { %2106 = vmatpush.bf16.msra.mxu1 %v3696_v49  ;;  %v3664_v49 = vor.u32 %v4050_v33, %v3663_v29  ;;  %v3817_v33 = vld [vmem:[#allocation4 + $0x164] sm:$0xf] }
  0x9c   :  { %2120 = vmatpush.bf16.msra.mxu2 %v2612_v50  ;;  %v2580_v50 = vor.u32 %v3777_v34, %v2577_v37  ;;  %v2737_v34 = vld [vmem:[#allocation4 + $0x168] sm:$0xf0]  ;;  %v3833_v37 = vld [vmem:[#allocation4 + $0x1e4] sm:$0xf] }
  0x9d   :  { %2134 = vmatpush.bf16.msra.mxu3 %v2676_v54  ;;  %v2644_v54 = vor.u32 %v3793_v42, %v2641_v45  ;;  %v2940_v42 = vor.u32 %v3867_v19, %v2937_v22  ;;  %v3811_v19 = vld [vmem:[#allocation4 + $0x134] sm:$0xf] }
  0x9e   :  { %2093 = vmatpush.bf16.msra.mxu0 %v3624_v61  ;;  %v3592_v61 = vor.u32 %v4032_v52, %v3591_v51  ;;  %v4296_v51 = vpack.c.bf16 %v114_v28, %v96_v27  ;;  %v3865_v52 = vld [vmem:[#allocation4 + $0x2e4] sm:$0xf]  ;;  %v2905_v27 = vld [vmem:[#allocation4 + $0x2b8] sm:$0xf0] }
  0x9f   :  { %2107 = vmatpush.bf16.msra.mxu1 %v3688_v62  ;;  %v3583_v62 = vld [vmem:[#allocation4 + $0x800] sm:$0xf] }
  0xa0   :  { %2121 = vmatpush.bf16.msra.mxu2 %v2604_v63  ;;  %v4030_v63 = vld [vmem:[#allocation4 + $0x804] sm:$0xf0] }
  0xa1   :  { %2135 = vmatpush.bf16.msra.mxu3 %v2668_v4  ;;  %v4046_v4 = vld [vmem:[#allocation4 + $0x884] sm:$0xf0]  ;;  %v3584_v15 = vor.u32 %v4030_v63, %v3583_v62  ;;  %v2793_v62 = vld [vmem:[#allocation4 + $0x1d8] sm:$0xf0]  ;;  %v3847_v63 = vld [vmem:[#allocation4 + $0x254] sm:$0xf] }
  0xa2   :  { %2094 = vmatpush.bf16.msra.mxu0 %v3616_v11  ;;  %v3819_v11 = vld [vmem:[#allocation4 + $0x174] sm:$0xf]  ;;  %v3648_v20 = vor.u32 %v4046_v4, %v3647_v0  ;;  %v2857_v0 = vld [vmem:[#allocation4 + $0x258] sm:$0xf0]  ;;  %v2732_v4 = vor.u32 %v3815_v57, %v2729_v59  ;;  %v2796_v5 = vor.u32 %v3831_v60, %v2793_v62 }
  0xa3   :  { %2108 = vmatpush.bf16.msra.mxu1 %v3680_v12  ;;  %v2745_v12 = vld [vmem:[#allocation4 + $0x178] sm:$0xf0]  ;;  %v2860_v6 = vor.u32 %v3847_v63, %v2857_v0  ;;  %v3807_v57 = vld [vmem:[#allocation4 + $0x114] sm:$0xf] }
  0xa4   :  { %2122 = vmatpush.bf16.msra.mxu2 %v2596_v13  ;;  %v3835_v13 = vld [vmem:[#allocation4 + $0x1f4] sm:$0xf]  ;;  %v2697_v59 = vld [vmem:[#allocation4 + $0x118] sm:$0xf0] }
  0xa5   :  { %2136 = vmatpush.bf16.msra.mxu3 %v2660_v18  ;;  %v2873_v18 = vld [vmem:[#allocation4 + $0x278] sm:$0xf0]  ;;  %v2812_v29 = vor.u32 %v3835_v13, %v2809_v14  ;;  %v3845_v13 = vld [vmem:[#allocation4 + $0x244] sm:$0xf]  ;;  %v2849_v14 = vld [vmem:[#allocation4 + $0x248] sm:$0xf0] }
  0xa6   :  { %2095 = vmatpush.bf16.msra.mxu0 %v3608_v24  ;;  %v113_v24 = vld [vmem:[#allocation2 + $0x110] sm:$0xff]  ;;  %v2761_v62 = vld [vmem:[#allocation4 + $0x198] sm:$0xf0] }
  0xa7   :  { %2109 = vmatpush.bf16.msra.mxu1 %v3672_v25  ;;  %v2628_v25 = vor.u32 %v3789_v8, %v2625_v9  ;;  %v4294_v45 = vpack.c.bf16 %v113_v24, %v95_v23  ;;  %v2721_v8 = vld [vmem:[#allocation4 + $0x148] sm:$0xf0]  ;;  %v3829_v9 = vld [vmem:[#allocation4 + $0x1c4] sm:$0xf]  ;;  %v2777_v23 = vld [vmem:[#allocation4 + $0x1b8] sm:$0xf0] }
  0xa8   :  { %2123 = vmatpush.bf16.msra.mxu2 %v2588_v26  ;;  %v2748_v26 = vor.u32 %v3819_v11, %v2745_v12  ;;  %v2785_v12 = vld [vmem:[#allocation4 + $0x1c8] sm:$0xf0]  ;;  %v3843_v24 = vld [vmem:[#allocation4 + $0x234] sm:$0xf]  ;;  %v2825_v0 = vld [vmem:[#allocation4 + $0x218] sm:$0xf0] }
  0xa9   :  { %2137 = vmatpush.bf16.msra.mxu3 %v2652_v30  ;;  %v2876_v30 = vor.u32 %v3851_v16, %v2873_v18  ;;  %v2913_v16 = vld [vmem:[#allocation4 + $0x2c8] sm:$0xf0]  ;;  %v2788_v18 = vor.u32 %v3829_v9, %v2785_v12  ;;  %v3823_v60 = vld [vmem:[#allocation4 + $0x194] sm:$0xf]  ;;  %v3821_v9 = vld [vmem:[#allocation4 + $0x184] sm:$0xf] }
  0xaa   :  { %2096 = vmatpush.bf16.msra.mxu0 %v3600_v48  ;;  %v2801_v48 = vld [vmem:[#allocation4 + $0x1e8] sm:$0xf0]  ;;  %v3839_v63 = vld [vmem:[#allocation4 + $0x214] sm:$0xf]  ;;  %v3837_v12 = vld [vmem:[#allocation4 + $0x204] sm:$0xf] }
  0xab   :  { %2110 = vmatpush.bf16.msra.mxu1 %v3664_v49  ;;  %v3849_v49 = vld [vmem:[#allocation4 + $0x264] sm:$0xf]  ;;  %v2804_v55 = vor.u32 %v3833_v37, %v2801_v48  ;;  %v2769_v48 = vld [vmem:[#allocation4 + $0x1a8] sm:$0xf0] }
  0xac   :  { %2124 = vmatpush.bf16.msra.mxu2 %v2580_v50  ;;  %v2865_v50 = vld [vmem:[#allocation4 + $0x268] sm:$0xf0]  ;;  %v3825_v37 = vld [vmem:[#allocation4 + $0x1a4] sm:$0xf] }
  0xad   :  { %2138 = vmatpush.bf16.msra.mxu3 %v2644_v54  ;;  %v2740_v54 = vor.u32 %v3817_v33, %v2737_v34  ;;  %v2868_v56 = vor.u32 %v3849_v49, %v2865_v50  ;;  %v3809_v33 = vld [vmem:[#allocation4 + $0x124] sm:$0xf]  ;;  %v2705_v34 = vld [vmem:[#allocation4 + $0x128] sm:$0xf0] }
  0xae   :  { %2097 = vmatpush.bf16.msra.mxu0 %v3592_v61  ;;  %v2932_v61 = vor.u32 %v3865_v52, %v2929_v53  ;;  %v3841_v49 = vld [vmem:[#allocation4 + $0x224] sm:$0xf]  ;;  %v2833_v50 = vld [vmem:[#allocation4 + $0x228] sm:$0xf0] }
  0xaf   :  { %2111 = vmatpush.bf16.msra.mxu1 %v3656_v2  ;;  %v3863_v2 = vld [vmem:[#allocation4 + $0x2d4] sm:$0xf]  ;;  %v3857_v52 = vld [vmem:[#allocation4 + $0x2a4] sm:$0xf]  ;;  %v2897_v53 = vld [vmem:[#allocation4 + $0x2a8] sm:$0xf0] }
  0xb0   :  { %2125 = vmatpush.bf16.msra.mxu2 %v2572_v3  ;;  %v2921_v3 = vld [vmem:[#allocation4 + $0x2d8] sm:$0xf0] }
  0xb1   :  { %2139 = vmatpush.bf16.msra.mxu3 %v2636_v7  ;;  %v3813_v7 = vld [vmem:[#allocation4 + $0x144] sm:$0xf]  ;;  %v2924_v11 = vor.u32 %v3863_v2, %v2921_v3  ;;  %v3855_v2 = vld [vmem:[#allocation4 + $0x294] sm:$0xf]  ;;  %v2889_v3 = vld [vmem:[#allocation4 + $0x298] sm:$0xf0] }
  0xb2   :  { %2098 = vmatpush.bf16.msra.mxu0 %v3584_v15  ;;  %v3861_v15 = vld [vmem:[#allocation4 + $0x2c4] sm:$0xf] }
  0xb3   :  { %2112 = vmatpush.bf16.msra.mxu1 %v3648_v20  ;;  %v2713_v20 = vld [vmem:[#allocation4 + $0x138] sm:$0xf0]  ;;  %v2916_v22 = vor.u32 %v3861_v15, %v2913_v16  ;;  %v3853_v15 = vld [vmem:[#allocation4 + $0x284] sm:$0xf]  ;;  %v2881_v16 = vld [vmem:[#allocation4 + $0x288] sm:$0xf0] }
  0xb4   :  { %2126 = vmatpush.bf16.msra.mxu2 %v2564_v21  ;;  %v3827_v21 = vld [vmem:[#allocation4 + $0x1b4] sm:$0xf]  ;;  %v2716_v28 = vor.u32 %v3811_v19, %v2713_v20  ;;  %v3065_v20 = vld [vmem:[#allocation4 + $0x3f8] sm:$0xf0] }
  0xb5   :  { %2140 = vmatpush.bf16.msra.mxu3 %v2628_v25  ;;  %2099 = vmatmul.bf16.vlgmr.msra.gmra.mxu0 %v4294_v45  ;;  %v2841_v25 = vld [vmem:[#allocation4 + $0x238] sm:$0xf0] }
  0xb6   :  { %2147 = vmatpush.bf16.msrb.mxu0 %v2748_v26  ;;  %2113 = vmatmul.bf16.vlgmr.msra.gmra.mxu1 %v4296_v51  ;;  %v3859_v26 = vld [vmem:[#allocation4 + $0x2b4] sm:$0xf] }
  0xb7   :  { %2161 = vmatpush.bf16.msrb.mxu1 %v2812_v29  ;;  %2127 = vmatmul.bf16.vlgmr.msra.gmra.mxu2 %v4246_v58  ;;  %v2724_v58 = vor.u32 %v3813_v7, %v2721_v8  ;;  %v2780_v29 = vor.u32 %v3827_v21, %v2777_v23  ;;  %v2764_v7 = vor.u32 %v3823_v60, %v2761_v62  ;;  %v3915_v21 = vld [vmem:[#allocation4 + $0x474] sm:$0xf]  ;;  %v3049_v62 = vld [vmem:[#allocation4 + $0x3d8] sm:$0xf0] }
  0xb8   :  { %2175 = vmatpush.bf16.msrb.mxu2 %v2876_v30  ;;  %2141 = vmatmul.bf16.vlgmr.msra.gmra.mxu3 %v4252_v10  ;;  %v2852_v10 = vor.u32 %v3845_v13, %v2849_v14  ;;  %v2844_v30 = vor.u32 %v3843_v24, %v2841_v25  ;;  %v2828_v8 = vor.u32 %v3839_v63, %v2825_v0  ;;  %v2817_v14 = vld [vmem:[#allocation4 + $0x208] sm:$0xf0]  ;;  %v3931_v25 = vld [vmem:[#allocation4 + $0x4f4] sm:$0xf]  ;;  %v3113_v0 = vld [vmem:[#allocation4 + $0x458] sm:$0xf0] }
  0xb9   :  { %2189 = vmatpush.bf16.msrb.mxu3 %v2940_v42  ;;  %v2908_v42 = vor.u32 %v3859_v26, %v2905_v27  ;;  %v2892_v13 = vor.u32 %v3855_v2, %v2889_v3  ;;  %v2820_v24 = vor.u32 %v3837_v12, %v2817_v14  ;;  %v3193_v26 = vld [vmem:[#allocation4 + $0x4f8] sm:$0xf0]  ;;  %v2884_v27 = vor.u32 %v3853_v15, %v2881_v16  ;;  %v3895_v60 = vld [vmem:[#allocation4 + $0x3d4] sm:$0xf]  ;;  %v3909_v12 = vld [vmem:[#allocation4 + $0x444] sm:$0xf] }
  0xba   :  { %2148 = vmatpush.bf16.msrb.mxu0 %v2740_v54  ;;  %v2708_v54 = vor.u32 %v3809_v33, %v2705_v34  ;;  %v3881_v33 = vld [vmem:[#allocation4 + $0x364] sm:$0xf]  ;;  %v2993_v34 = vld [vmem:[#allocation4 + $0x368] sm:$0xf0]  ;;  %v3911_v63 = vld [vmem:[#allocation4 + $0x454] sm:$0xf] }
  0xbb   :  { %2162 = vmatpush.bf16.msrb.mxu1 %v2804_v55  ;;  %v2772_v55 = vor.u32 %v3825_v37, %v2769_v48  ;;  %v3897_v37 = vld [vmem:[#allocation4 + $0x3e4] sm:$0xf]  ;;  %v3057_v48 = vld [vmem:[#allocation4 + $0x3e8] sm:$0xf0]  ;;  %v3927_v2 = vld [vmem:[#allocation4 + $0x4d4] sm:$0xf] }
  0xbc   :  { %2176 = vmatpush.bf16.msrb.mxu2 %v2868_v56  ;;  %v2836_v56 = vor.u32 %v3841_v49, %v2833_v50  ;;  %v3913_v49 = vld [vmem:[#allocation4 + $0x464] sm:$0xf]  ;;  %v3121_v50 = vld [vmem:[#allocation4 + $0x468] sm:$0xf0]  ;;  %v3177_v3 = vld [vmem:[#allocation4 + $0x4d8] sm:$0xf0] }
  0xbd   :  { %2190 = vmatpush.bf16.msrb.mxu3 %v2932_v61  ;;  %v2900_v61 = vor.u32 %v3857_v52, %v2897_v53  ;;  %v3929_v52 = vld [vmem:[#allocation4 + $0x4e4] sm:$0xf]  ;;  %v3185_v53 = vld [vmem:[#allocation4 + $0x4e8] sm:$0xf0]  ;;  %v3875_v16 = vld [vmem:[#allocation4 + $0x334] sm:$0xf] }
  0xbe   :  { %2149 = vmatpush.bf16.msrb.mxu0 %v2732_v4  ;;  %v2700_v4 = vor.u32 %v3807_v57, %v2697_v59  ;;  %v3879_v57 = vld [vmem:[#allocation4 + $0x354] sm:$0xf]  ;;  %v2985_v59 = vld [vmem:[#allocation4 + $0x358] sm:$0xf0] }
  0xbf   :  { %2163 = vmatpush.bf16.msrb.mxu1 %v2796_v5  ;;  %v3805_v5 = vld [vmem:[#allocation4 + $0x104] sm:$0xf] }
  0xc0   :  { %2177 = vmatpush.bf16.msrb.mxu2 %v2860_v6  ;;  %v2689_v6 = vld [vmem:[#allocation4 + $0x108] sm:$0xf0] }
  0xc1   :  { %2191 = vmatpush.bf16.msrb.mxu3 %v2924_v11  ;;  %v2753_v11 = vld [vmem:[#allocation4 + $0x188] sm:$0xf0]  ;;  %v2692_v19 = vor.u32 %v3805_v5, %v2689_v6  ;;  %v3052_v5 = vor.u32 %v3895_v60, %v3049_v62  ;;  %v3116_v6 = vor.u32 %v3911_v63, %v3113_v0  ;;  %v3081_v60 = vld [vmem:[#allocation4 + $0x418] sm:$0xf0]  ;;  %v3869_v0 = vld [vmem:[#allocation4 + $0x304] sm:$0xf] }
  0xc2   :  { %2150 = vmatpush.bf16.msrb.mxu0 %v2724_v58  ;;  %v3883_v58 = vld [vmem:[#allocation4 + $0x374] sm:$0xf]  ;;  %v2756_v23 = vor.u32 %v3821_v9, %v2753_v11  ;;  %v3180_v9 = vor.u32 %v3927_v2, %v3177_v3  ;;  %v3041_v11 = vld [vmem:[#allocation4 + $0x3c8] sm:$0xf0]  ;;  %v3145_v62 = vld [vmem:[#allocation4 + $0x498] sm:$0xf0] }
  0xc3   :  { %2164 = vmatpush.bf16.msrb.mxu1 %v2788_v18  ;;  %v3001_v18 = vld [vmem:[#allocation4 + $0x378] sm:$0xf0]  ;;  %v2945_v2 = vld [vmem:[#allocation4 + $0x308] sm:$0xf0] }
  0xc4   :  { %2178 = vmatpush.bf16.msrb.mxu2 %v2852_v10  ;;  %v3899_v10 = vld [vmem:[#allocation4 + $0x3f4] sm:$0xf] }
  0xc5   :  { %2192 = vmatpush.bf16.msrb.mxu3 %v2916_v22  ;;  %v3129_v22 = vld [vmem:[#allocation4 + $0x478] sm:$0xf0] }
  0xc6   :  { %2151 = vmatpush.bf16.msrb.mxu0 %v2716_v28  ;;  %v3004_v28 = vor.u32 %v3883_v58, %v3001_v18  ;;  %v2969_v58 = vld [vmem:[#allocation4 + $0x338] sm:$0xf0]  ;;  %v3891_v18 = vld [vmem:[#allocation4 + $0x3b4] sm:$0xf] }
  0xc7   :  { %2165 = vmatpush.bf16.msrb.mxu1 %v2780_v29  ;;  %v3068_v29 = vor.u32 %v3899_v10, %v3065_v20  ;;  %v3907_v20 = vld [vmem:[#allocation4 + $0x434] sm:$0xf] }
  0xc8   :  { %2179 = vmatpush.bf16.msrb.mxu2 %v2844_v30  ;;  %v3132_v30 = vor.u32 %v3915_v21, %v3129_v22  ;;  %v3097_v21 = vld [vmem:[#allocation4 + $0x438] sm:$0xf0]  ;;  %v3923_v22 = vld [vmem:[#allocation4 + $0x4b4] sm:$0xf] }
  0xc9   :  { %2193 = vmatpush.bf16.msrb.mxu3 %v2908_v42  ;;  %v3196_v42 = vor.u32 %v3931_v25, %v3193_v26  ;;  %v3100_v26 = vor.u32 %v3907_v20, %v3097_v21  ;;  %v3449_v20 = vld [vmem:[#allocation4 + $0x6f8] sm:$0xf0] }
  0xca   :  { %2152 = vmatpush.bf16.msrb.mxu0 %v2708_v54  ;;  %v2996_v54 = vor.u32 %v3881_v33, %v2993_v34  ;;  %v3025_v33 = vld [vmem:[#allocation4 + $0x3a8] sm:$0xf0]  ;;  %v3905_v34 = vld [vmem:[#allocation4 + $0x424] sm:$0xf] }
  0xcb   :  { %2166 = vmatpush.bf16.msrb.mxu1 %v2772_v55  ;;  %v3060_v55 = vor.u32 %v3897_v37, %v3057_v48  ;;  %v3089_v37 = vld [vmem:[#allocation4 + $0x428] sm:$0xf0] }
  0xcc   :  { %2180 = vmatpush.bf16.msrb.mxu2 %v2836_v56  ;;  %v3124_v56 = vor.u32 %v3913_v49, %v3121_v50  ;;  %v3153_v48 = vld [vmem:[#allocation4 + $0x4a8] sm:$0xf0] }
  0xcd   :  { %2194 = vmatpush.bf16.msrb.mxu3 %v2900_v61  ;;  %v3188_v61 = vor.u32 %v3929_v52, %v3185_v53  ;;  %v3092_v52 = vor.u32 %v3905_v34, %v3089_v37  ;;  %v3871_v53 = vld [vmem:[#allocation4 + $0x314] sm:$0xf]  ;;  %v3993_v34 = vld [vmem:[#allocation4 + $0x6e4] sm:$0xf]  ;;  %v3441_v37 = vld [vmem:[#allocation4 + $0x6e8] sm:$0xf0] }
  0xce   :  { %2153 = vmatpush.bf16.msrb.mxu0 %v2700_v4  ;;  %v2988_v4 = vor.u32 %v3879_v57, %v2985_v59  ;;  %v3017_v57 = vld [vmem:[#allocation4 + $0x398] sm:$0xf0]  ;;  %v3903_v59 = vld [vmem:[#allocation4 + $0x414] sm:$0xf] }
  0xcf   :  { %2167 = vmatpush.bf16.msrb.mxu1 %v2764_v7  ;;  %v3877_v7 = vld [vmem:[#allocation4 + $0x344] sm:$0xf] }
  0xd0   :  { %2181 = vmatpush.bf16.msrb.mxu2 %v2828_v8  ;;  %v3893_v8 = vld [vmem:[#allocation4 + $0x3c4] sm:$0xf] }
  0xd1   :  { %2195 = vmatpush.bf16.msrb.mxu3 %v2892_v13  ;;  %v3925_v13 = vld [vmem:[#allocation4 + $0x4c4] sm:$0xf] }
  0xd2   :  { %2154 = vmatpush.bf16.msrb.mxu0 %v2692_v19  ;;  %v3033_v19 = vld [vmem:[#allocation4 + $0x3b8] sm:$0xf0] }
  0xd3   :  { %2168 = vmatpush.bf16.msrb.mxu1 %v2756_v23  ;;  %v3161_v23 = vld [vmem:[#allocation4 + $0x4b8] sm:$0xf0]  ;;  %v3036_v25 = vor.u32 %v3891_v18, %v3033_v19  ;;  %v3995_v19 = vld [vmem:[#allocation4 + $0x6f4] sm:$0xf] }
  0xd4   :  { %2182 = vmatpush.bf16.msrb.mxu2 %v2820_v24  ;;  %v2972_v24 = vor.u32 %v3875_v16, %v2969_v58  ;;  %v3979_v16 = vld [vmem:[#allocation4 + $0x674] sm:$0xf]  ;;  %v3385_v58 = vld [vmem:[#allocation4 + $0x678] sm:$0xf0] }
  0xd5   :  { %2196 = vmatpush.bf16.msrb.mxu3 %v2884_v27  ;;  %2155 = vmatmul.bf16.vlgmr.msrb.gmra.mxu0 %v4248_v1  ;;  %v2977_v1 = vld [vmem:[#allocation4 + $0x348] sm:$0xf0]  ;;  %v3873_v27 = vld [vmem:[#allocation4 + $0x324] sm:$0xf] }
  0xd6   :  { %2203 = vmatpush.bf16.msra.mxu0 %v3004_v28  ;;  %2169 = vmatmul.bf16.vlgmr.msrb.gmra.mxu1 %v4254_v17  ;;  %v3169_v17 = vld [vmem:[#allocation4 + $0x4c8] sm:$0xf0]  ;;  %v2980_v14 = vor.u32 %v3877_v7, %v2977_v1  ;;  %v3901_v7 = vld [vmem:[#allocation4 + $0x404] sm:$0xf] }
  0xd7   :  { %2217 = vmatpush.bf16.msra.mxu1 %v3068_v29  ;;  %2183 = vmatmul.bf16.vlgmr.msrb.gmra.mxu2 %v4258_v39  ;;  %v3105_v39 = vld [vmem:[#allocation4 + $0x448] sm:$0xf0]  ;;  %v3172_v10 = vor.u32 %v3925_v13, %v3169_v17  ;;  %v3889_v29 = vld [vmem:[#allocation4 + $0x3a4] sm:$0xf]  ;;  %v3257_v13 = vld [vmem:[#allocation4 + $0x578] sm:$0xf0] }
  0xd8   :  { %2231 = vmatpush.bf16.msra.mxu2 %v3132_v30  ;;  %2197 = vmatmul.bf16.vlgmr.msrb.gmra.mxu3 %v4262_v44  ;;  %v3044_v44 = vor.u32 %v3893_v8, %v3041_v11  ;;  %v3108_v15 = vor.u32 %v3909_v12, %v3105_v39  ;;  %v2961_v28 = vld [vmem:[#allocation4 + $0x328] sm:$0xf0]  ;;  %v3164_v30 = vor.u32 %v3923_v22, %v3161_v23  ;;  %v4306_v12 = vpop.f32.mrf.mxu0  ;;  %v3947_v39 = vld [vmem:[#allocation4 + $0x574] sm:$0xf] }
  0xd9   :  { %2245 = vmatpush.bf16.msra.mxu3 %v3196_v42  ;;  %v3921_v42 = vld [vmem:[#allocation4 + $0x4a4] sm:$0xf]  ;;  %v2964_v49 = vor.u32 %v3873_v27, %v2961_v28  ;;  %v3028_v50 = vor.u32 %v3889_v29, %v3025_v33  ;;  %v3073_v8 = vld [vmem:[#allocation4 + $0x408] sm:$0xf0]  ;;  %v3963_v17 = vld [vmem:[#allocation4 + $0x5f4] sm:$0xf]  ;;  %v3260_v22 = vor.u32 %v3947_v39, %v3257_v13  ;;  %v3452_v28 = vor.u32 %v3995_v19, %v3449_v20 }
  0xda   :  { %2204 = vmatpush.bf16.msra.mxu0 %v2996_v54  ;;  %v2953_v54 = vld [vmem:[#allocation4 + $0x318] sm:$0xf0]  ;;  %v3137_v11 = vld [vmem:[#allocation4 + $0x488] sm:$0xf0]  ;;  %v3961_v27 = vld [vmem:[#allocation4 + $0x5e4] sm:$0xf] }
  0xdb   :  { %2218 = vmatpush.bf16.msra.mxu1 %v3060_v55  ;;  %v3887_v55 = vld [vmem:[#allocation4 + $0x394] sm:$0xf]  ;;  %v2956_v63 = vor.u32 %v3871_v53, %v2953_v54  ;;  %v3313_v29 = vld [vmem:[#allocation4 + $0x5e8] sm:$0xf0]  ;;  %v4310_v54 = vpop.f32.mrf.mxu2  ;;  %v3417_v19 = vld [vmem:[#allocation4 + $0x6b8] sm:$0xf0] }
  0xdc   :  { %2232 = vmatpush.bf16.msra.mxu2 %v3124_v56  ;;  %v3156_v56 = vor.u32 %v3921_v42, %v3153_v48  ;;  %v3020_v3 = vor.u32 %v3887_v55, %v3017_v57  ;;  %v3377_v33 = vld [vmem:[#allocation4 + $0x668] sm:$0xf0]  ;;  %v3316_v48 = vor.u32 %v3961_v27, %v3313_v29  ;;  %v3959_v53 = vld [vmem:[#allocation4 + $0x5d4] sm:$0xf]  ;;  %v3444_v55 = vor.u32 %v3993_v34, %v3441_v37  ;;  %v3953_v27 = vld [vmem:[#allocation4 + $0x5a4] sm:$0xf] }
  0xdd   :  { %2246 = vmatpush.bf16.msra.mxu3 %v3188_v61  ;;  %v3919_v61 = vld [vmem:[#allocation4 + $0x494] sm:$0xf]  ;;  %v3345_v34 = vld [vmem:[#allocation4 + $0x628] sm:$0xf0]  ;;  %v3985_v37 = vld [vmem:[#allocation4 + $0x6a4] sm:$0xf] }
  0xde   :  { %2205 = vmatpush.bf16.msra.mxu0 %v2988_v4  ;;  %v3084_v4 = vor.u32 %v3903_v59, %v3081_v60  ;;  %v3148_v1 = vor.u32 %v3919_v61, %v3145_v62  ;;  %v3975_v57 = vld [vmem:[#allocation4 + $0x654] sm:$0xf]  ;;  %v3369_v59 = vld [vmem:[#allocation4 + $0x658] sm:$0xf0] }
  0xdf   :  { %2219 = vmatpush.bf16.msra.mxu1 %v3052_v5  ;;  %v3885_v5 = vld [vmem:[#allocation4 + $0x384] sm:$0xf]  ;;  %v3991_v61 = vld [vmem:[#allocation4 + $0x6d4] sm:$0xf]  ;;  %v3433_v62 = vld [vmem:[#allocation4 + $0x6d8] sm:$0xf0] }
  0xe0   :  { %2233 = vmatpush.bf16.msra.mxu2 %v3116_v6  ;;  %v3009_v6 = vld [vmem:[#allocation4 + $0x388] sm:$0xf0]  ;;  %v4313_v60 = vpop.f32.mrf.mxu0  ;;  %v3939_v13 = vld [vmem:[#allocation4 + $0x534] sm:$0xf] }
  0xe1   :  { %2247 = vmatpush.bf16.msra.mxu3 %v3180_v9  ;;  %v3917_v9 = vld [vmem:[#allocation4 + $0x484] sm:$0xf]  ;;  %v3012_v18 = vor.u32 %v3885_v5, %v3009_v6  ;;  %v4320_v6 = vpop.f32.mrf.mxu3 }
  0xe2   :  { %2206 = vmatpush.bf16.msra.mxu0 %v2980_v14  ;;  %v4308_v14 = vpop.f32.mrf.mxu1  ;;  %v3140_v21 = vor.u32 %v3917_v9, %v3137_v11  ;;  %v3957_v5 = vld [vmem:[#allocation4 + $0x5c4] sm:$0xf]  ;;  %v3425_v9 = vld [vmem:[#allocation4 + $0x6c8] sm:$0xf0] }
  0xe3   :  { %2220 = vmatpush.bf16.msra.mxu1 %v3044_v44  ;;  %v2948_v44 = vor.u32 %v3869_v0, %v2945_v2  ;;  %v3372_v2 = vor.u32 %v3975_v57, %v3369_v59  ;;  %v4322_v20 = vpop.f32.mrf.mxu2  ;;  %v3951_v57 = vld [vmem:[#allocation4 + $0x594] sm:$0xf] }
  0xe4   :  { %2234 = vmatpush.bf16.msra.mxu2 %v3108_v15  ;;  %v3321_v15 = vld [vmem:[#allocation4 + $0x5f8] sm:$0xf0] }
  0xe5   :  { %2248 = vmatpush.bf16.msra.mxu3 %v3172_v10  ;;  %v3076_v10 = vor.u32 %v3901_v7, %v3073_v8  ;;  %v3324_v23 = vor.u32 %v3963_v17, %v3321_v15  ;;  %v3973_v7 = vld [vmem:[#allocation4 + $0x644] sm:$0xf]  ;;  %v3225_v17 = vld [vmem:[#allocation4 + $0x538] sm:$0xf0] }
  0xe6   :  { %2207 = vmatpush.bf16.msra.mxu0 %v2972_v24  ;;  %v3388_v24 = vor.u32 %v3979_v16, %v3385_v58  ;;  %v3989_v8 = vld [vmem:[#allocation4 + $0x6c4] sm:$0xf]  ;;  %v3289_v16 = vld [vmem:[#allocation4 + $0x5b8] sm:$0xf0]  ;;  %v3971_v58 = vld [vmem:[#allocation4 + $0x634] sm:$0xf] }
  0xe7   :  { %2221 = vmatpush.bf16.msra.mxu1 %v3036_v25  ;;  %v3945_v25 = vld [vmem:[#allocation4 + $0x564] sm:$0xf]  ;;  %v3428_v15 = vor.u32 %v3989_v8, %v3425_v9  ;;  %v3265_v8 = vld [vmem:[#allocation4 + $0x588] sm:$0xf0] }
  0xe8   :  { %2235 = vmatpush.bf16.msra.mxu2 %v3100_v26  ;;  %v3249_v26 = vld [vmem:[#allocation4 + $0x568] sm:$0xf0]  ;;  %v3965_v9 = vld [vmem:[#allocation4 + $0x604] sm:$0xf] }
  0xe9   :  { %2249 = vmatpush.bf16.msra.mxu3 %v3164_v30  ;;  %v3977_v30 = vld [vmem:[#allocation4 + $0x664] sm:$0xf]  ;;  %v3252_v42 = vor.u32 %v3945_v25, %v3249_v26  ;;  %v3217_v26 = vld [vmem:[#allocation4 + $0x528] sm:$0xf0] }
  0xea   :  { %2208 = vmatpush.bf16.msra.mxu0 %v2964_v49  ;;  %v3380_v49 = vor.u32 %v3977_v30, %v3377_v33  ;;  %v3937_v25 = vld [vmem:[#allocation4 + $0x524] sm:$0xf]  ;;  %v3281_v30 = vld [vmem:[#allocation4 + $0x5a8] sm:$0xf0] }
  0xeb   :  { %2222 = vmatpush.bf16.msra.mxu1 %v3028_v50  ;;  %v3943_v50 = vld [vmem:[#allocation4 + $0x554] sm:$0xf]  ;;  %v3969_v33 = vld [vmem:[#allocation4 + $0x624] sm:$0xf] }
  0xec   :  { %2236 = vmatpush.bf16.msra.mxu2 %v3092_v52  ;;  %v3241_v52 = vld [vmem:[#allocation4 + $0x558] sm:$0xf0] }
  0xed   :  { %2250 = vmatpush.bf16.msra.mxu3 %v3156_v56  ;;  %v3305_v56 = vld [vmem:[#allocation4 + $0x5d8] sm:$0xf0]  ;;  %v3244_v0 = vor.u32 %v3943_v50, %v3241_v52  ;;  %v3220_v50 = vor.u32 %v3937_v25, %v3217_v26  ;;  %v3284_v52 = vor.u32 %v3953_v27, %v3281_v30 }
  0xee   :  { %2209 = vmatpush.bf16.msra.mxu0 %v2956_v63  ;;  %v4317_v63 = vpop.f32.mrf.mxu1  ;;  %v3705_v30 = vld [vmem:[#allocation4 + $0x8f8] sm:$0xf0] }
  0xef   :  { %2223 = vmatpush.bf16.msra.mxu1 %v3020_v3  ;;  %v3941_v3 = vld [vmem:[#allocation4 + $0x544] sm:$0xf] }
  0xf0   :  { %2237 = vmatpush.bf16.msra.mxu2 %v3084_v4  ;;  %v3233_v4 = vld [vmem:[#allocation4 + $0x548] sm:$0xf0] }
  0xf1   :  { %2251 = vmatpush.bf16.msra.mxu3 %v3148_v1  ;;  %v3361_v1 = vld [vmem:[#allocation4 + $0x648] sm:$0xf0] }
  0xf2   :  { %2210 = vmatpush.bf16.msra.mxu0 %v2948_v44  ;;  %v3364_v39 = vor.u32 %v3973_v7, %v3361_v1  ;;  %v3955_v44 = vld [vmem:[#allocation4 + $0x5b4] sm:$0xf]  ;;  %v3949_v1 = vld [vmem:[#allocation4 + $0x584] sm:$0xf] }
  0xf3   :  { %2224 = vmatpush.bf16.msra.mxu1 %v3012_v18  ;;  %v3353_v18 = vld [vmem:[#allocation4 + $0x638] sm:$0xf0]  ;;  %v3268_v26 = vor.u32 %v3949_v1, %v3265_v8  ;;  %v4039_v8 = vld [vmem:[#allocation4 + $0x854] sm:$0xf] }
  0xf4   :  { %2238 = vmatpush.bf16.msra.mxu2 %v3076_v10  ;;  %v3987_v10 = vld [vmem:[#allocation4 + $0x6b4] sm:$0xf]  ;;  %v3561_v1 = vld [vmem:[#allocation4 + $0x7d8] sm:$0xf0] }
  0xf5   :  { %2252 = vmatpush.bf16.msra.mxu3 %v3140_v21  ;;  %2211 = vmatmul.bf16.vlgmr.msra.gmra.mxu0 %v4260_v43  ;;  %v3308_v43 = vor.u32 %v3959_v53, %v3305_v56  ;;  %v3228_v21 = vor.u32 %v3939_v13, %v3225_v17  ;;  %v3420_v29 = vor.u32 %v3987_v10, %v3417_v19  ;;  %v3209_v56 = vld [vmem:[#allocation4 + $0x518] sm:$0xf0]  ;;  %v3981_v13 = vld [vmem:[#allocation4 + $0x684] sm:$0xf]  ;;  %v3393_v17 = vld [vmem:[#allocation4 + $0x688] sm:$0xf0] }
  0xf6   :  { %2259 = vmatpush.bf16.msrb.mxu0 %v3260_v22  ;;  %2225 = vmatmul.bf16.vlgmr.msra.gmra.mxu1 %v4264_v47  ;;  %v3297_v47 = vld [vmem:[#allocation4 + $0x5c8] sm:$0xf0]  ;;  %v4324_v22 = vpop.f32.mrf.mxu0  ;;  %v3348_v53 = vor.u32 %v3969_v33, %v3345_v34  ;;  %v3396_v34 = vor.u32 %v3981_v13, %v3393_v17  ;;  %v4055_v13 = vld [vmem:[#allocation4 + $0x8d4] sm:$0xf]  ;;  %v3689_v17 = vld [vmem:[#allocation4 + $0x8d8] sm:$0xf0] }
  0xf7   :  { %2273 = vmatpush.bf16.msrb.mxu1 %v3324_v23  ;;  %2239 = vmatmul.bf16.vlgmr.msra.gmra.mxu2 %v4270_v31  ;;  %v3436_v31 = vor.u32 %v3991_v61, %v3433_v62  ;;  %v3300_v11 = vor.u32 %v3957_v5, %v3297_v47  ;;  %v3292_v23 = vor.u32 %v3955_v44, %v3289_v16  ;;  %v3273_v61 = vld [vmem:[#allocation4 + $0x598] sm:$0xf0]  ;;  %v3967_v62 = vld [vmem:[#allocation4 + $0x614] sm:$0xf]  ;;  %v3933_v5 = vld [vmem:[#allocation4 + $0x504] sm:$0xf] }
  0xf8   :  { %2287 = vmatpush.bf16.msrb.mxu2 %v3388_v24  ;;  %2253 = vmatmul.bf16.vlgmr.msra.gmra.mxu3 %v4274_v36  ;;  %v3236_v36 = vor.u32 %v3941_v3, %v3233_v4  ;;  %v3356_v24 = vor.u32 %v3971_v58, %v3353_v18  ;;  %v3276_v47 = vor.u32 %v3951_v57, %v3273_v61  ;;  %v3513_v16 = vld [vmem:[#allocation4 + $0x778] sm:$0xf0]  ;;  %v4027_v58 = vld [vmem:[#allocation4 + $0x7f4] sm:$0xf]  ;;  %v3633_v57 = vld [vmem:[#allocation4 + $0x868] sm:$0xf0] }
  0xf9   :  { %2301 = vmatpush.bf16.msrb.mxu3 %v3452_v28  ;;  %v4326_v28 = vpop.f32.mrf.mxu1 }
  0xfa   :  { %2260 = vmatpush.bf16.msrb.mxu0 %v3252_v42  ;;  %v3409_v42 = vld [vmem:[#allocation4 + $0x6a8] sm:$0xf0] }
  0xfb   :  { %2274 = vmatpush.bf16.msrb.mxu1 %v3316_v48  ;;  %v4328_v48 = vld [vmem:[#allocation6] sm:$0x3]  ;;  %v3412_v59 = vor.u32 %v3985_v37, %v3409_v42 }
  0xfc   :  { %2288 = vmatpush.bf16.msrb.mxu2 %v3380_v49  ;;  %v4330_v49 = vpop.f32.mrf.mxu3  ;;  %v423_v3 = vperm.slane %v4328_v48, 0 }
  0xfd   :  { %2302 = vmatpush.bf16.msrb.mxu3 %v3444_v55  ;;  %v3935_v55 = vld [vmem:[#allocation4 + $0x514] sm:$0xf] }
  0xfe   :  { %2261 = vmatpush.bf16.msrb.mxu0 %v3244_v0  ;;  %v3337_v0 = vld [vmem:[#allocation4 + $0x618] sm:$0xf0]  ;;  %v3212_v4 = vor.u32 %v3935_v55, %v3209_v56  ;;  %v4335_v44 = vpop.f32.mrf.mxu0  ;;  %v1877_v18 = vadd.f32 %v4306_v12, %v423_v3  ;;  %v1879_v25 = vadd.f32 %v4313_v60, %v423_v3  ;;  %v3569_v56 = vld [vmem:[#allocation4 + $0x7e8] sm:$0xf0]  ;;  %v4041_v60 = vld [vmem:[#allocation4 + $0x864] sm:$0xf] }
  0xff   :  { %2275 = vmatpush.bf16.msrb.mxu1 %v3308_v43  ;;  %v3983_v43 = vld [vmem:[#allocation4 + $0x694] sm:$0xf]  ;;  %v3340_v7 = vor.u32 %v3967_v62, %v3337_v0  ;;  %v4057_v62 = vld [vmem:[#allocation4 + $0x8e4] sm:$0xf]  ;;  %v3697_v0 = vld [vmem:[#allocation4 + $0x8e8] sm:$0xf0] }
 0x100   :  { %2289 = vmatpush.bf16.msrb.mxu2 %v3372_v2  ;;  %v3401_v2 = vld [vmem:[#allocation4 + $0x698] sm:$0xf0]  ;;  %v1893_v61 = vadd.f32 %v4317_v63, %v1879_v25  ;;  %v3700_v63 = vor.u32 %v4057_v62, %v3697_v0  ;;  %v3681_v25 = vld [vmem:[#allocation4 + $0x8c8] sm:$0xf0]  ;;  %v4001_v0 = vld [vmem:[#allocation4 + $0x724] sm:$0xf] }
 0x101   :  { %2303 = vmatpush.bf16.msrb.mxu3 %v3436_v31  ;;  %v3201_v31 = vld [vmem:[#allocation4 + $0x508] sm:$0xf0]  ;;  %v4338_v10 = vpop.f32.mrf.mxu1 }
 0x102   :  { %2262 = vmatpush.bf16.msrb.mxu0 %v3236_v36  ;;  %v4333_v36 = vpop.f32.mrf.mxu2  ;;  %v3204_v19 = vor.u32 %v3933_v5, %v3201_v31  ;;  %v4007_v5 = vld [vmem:[#allocation4 + $0x754] sm:$0xf]  ;;  %v3497_v31 = vld [vmem:[#allocation4 + $0x758] sm:$0xf0] }
 0x103   :  { %2276 = vmatpush.bf16.msrb.mxu1 %v3300_v11  ;;  %v3404_v11 = vor.u32 %v3983_v43, %v3401_v2 }
 0x104   :  { %2290 = vmatpush.bf16.msrb.mxu2 %v3364_v39  ;;  %v3329_v39 = vld [vmem:[#allocation4 + $0x608] sm:$0xf0]  ;;  %v4341_v33 = vpop.f32.mrf.mxu3 }
 0x105   :  { %2304 = vmatpush.bf16.msrb.mxu3 %v3428_v15  ;;  %v4011_v15 = vld [vmem:[#allocation4 + $0x774] sm:$0xf]  ;;  %v3332_v27 = vor.u32 %v3965_v9, %v3329_v39  ;;  %v3625_v9 = vld [vmem:[#allocation4 + $0x858] sm:$0xf0]  ;;  %v1907_v39 = vadd.f32 %v4322_v20, %v1893_v61  ;;  %v3692_v20 = vor.u32 %v4055_v13, %v3689_v17 }
 0x106   :  { %2263 = vmatpush.bf16.msrb.mxu0 %v3228_v21  ;;  %v3577_v21 = vld [vmem:[#allocation4 + $0x7f8] sm:$0xf0]  ;;  %v3516_v12 = vor.u32 %v4011_v15, %v3513_v16  ;;  %v4345_v2 = vpop.f32.mrf.mxu0  ;;  %v3500_v15 = vor.u32 %v4007_v5, %v3497_v31  ;;  %v3628_v16 = vor.u32 %v4039_v8, %v3625_v9  ;;  %v3537_v5 = vld [vmem:[#allocation4 + $0x7a8] sm:$0xf0]  ;;  %v3999_v17 = vld [vmem:[#allocation4 + $0x714] sm:$0xf] }
 0x107   :  { %2277 = vmatpush.bf16.msrb.mxu1 %v3292_v23  ;;  %v4043_v23 = vld [vmem:[#allocation4 + $0x874] sm:$0xf]  ;;  %v3580_v37 = vor.u32 %v4027_v58, %v3577_v21  ;;  %v4005_v58 = vld [vmem:[#allocation4 + $0x744] sm:$0xf]  ;;  %v3601_v31 = vld [vmem:[#allocation4 + $0x828] sm:$0xf0] }
 0x108   :  { %2291 = vmatpush.bf16.msrb.mxu2 %v3356_v24  ;;  %v3641_v24 = vld [vmem:[#allocation4 + $0x878] sm:$0xf0]  ;;  %v4037_v21 = vld [vmem:[#allocation4 + $0x844] sm:$0xf]  ;;  %v3665_v8 = vld [vmem:[#allocation4 + $0x8a8] sm:$0xf0] }
 0x109   :  { %2305 = vmatpush.bf16.msrb.mxu3 %v3420_v29  ;;  %v4059_v29 = vld [vmem:[#allocation4 + $0x8f4] sm:$0xf]  ;;  %v3644_v42 = vor.u32 %v4043_v23, %v3641_v24  ;;  %v4053_v24 = vld [vmem:[#allocation4 + $0x8c4] sm:$0xf] }
 0x10a   :  { %2264 = vmatpush.bf16.msrb.mxu0 %v3220_v50  ;;  %v4009_v50 = vld [vmem:[#allocation4 + $0x764] sm:$0xf]  ;;  %v3708_v55 = vor.u32 %v4059_v29, %v3705_v30  ;;  %v4003_v30 = vld [vmem:[#allocation4 + $0x734] sm:$0xf] }
 0x10b   :  { %2278 = vmatpush.bf16.msrb.mxu1 %v3284_v52  ;;  %v3505_v52 = vld [vmem:[#allocation4 + $0x768] sm:$0xf0] }
 0x10c   :  { %2292 = vmatpush.bf16.msrb.mxu2 %v3348_v53  ;;  %v4025_v53 = vld [vmem:[#allocation4 + $0x7e4] sm:$0xf]  ;;  %v3508_v43 = vor.u32 %v4009_v50, %v3505_v52  ;;  %v3545_v50 = vld [vmem:[#allocation4 + $0x7b8] sm:$0xf0]  ;;  %v4035_v52 = vld [vmem:[#allocation4 + $0x834] sm:$0xf] }
 0x10d   :  { %2306 = vmatpush.bf16.msrb.mxu3 %v3412_v59  ;;  %v1891_v59 = vadd.f32 %v4308_v14, %v1877_v18  ;;  %v3572_v3 = vor.u32 %v4025_v53, %v3569_v56  ;;  %v4349_v14 = vpop.f32.mrf.mxu1  ;;  %v3489_v18 = vld [vmem:[#allocation4 + $0x748] sm:$0xf0]  ;;  %v4051_v56 = vld [vmem:[#allocation4 + $0x8b4] sm:$0xf] }
 0x10e   :  { %2265 = vmatpush.bf16.msrb.mxu0 %v3212_v4  ;;  %v3636_v4 = vor.u32 %v4041_v60, %v3633_v57  ;;  %v3673_v60 = vld [vmem:[#allocation4 + $0x8b8] sm:$0xf0] }
 0x10f   :  { %2279 = vmatpush.bf16.msrb.mxu1 %v3276_v47  ;;  %v4023_v47 = vld [vmem:[#allocation4 + $0x7d4] sm:$0xf] }
 0x110   :  { %2293 = vmatpush.bf16.msrb.mxu2 %v3340_v7  ;;  %v4347_v7 = vpop.f32.mrf.mxu2 }
 0x111   :  { %2307 = vmatpush.bf16.msrb.mxu3 %v3404_v11  ;;  %v1905_v11 = vadd.f32 %v4310_v54, %v1891_v59  ;;  %v4357_v54 = vpop.f32.mrf.mxu3 }
 0x112   :  { %2266 = vmatpush.bf16.msrb.mxu0 %v3204_v19  ;;  %v4021_v19 = vld [vmem:[#allocation4 + $0x7c4] sm:$0xf] }
 0x113   :  { %2280 = vmatpush.bf16.msrb.mxu1 %v3268_v26  ;;  %v1919_v23 = vadd.f32 %v4320_v6, %v1905_v11  ;;  %v3492_v26 = vor.u32 %v4005_v58, %v3489_v18  ;;  %v3609_v6 = vld [vmem:[#allocation4 + $0x838] sm:$0xf0]  ;;  %v4031_v18 = vld [vmem:[#allocation4 + $0x814] sm:$0xf] }
 0x114   :  { %2294 = vmatpush.bf16.msrb.mxu2 %v3332_v27  ;;  %v3612_v62 = vor.u32 %v4035_v52, %v3609_v6  ;;  %v3529_v58 = vld [vmem:[#allocation4 + $0x798] sm:$0xf0]  ;;  %v3649_v52 = vld [vmem:[#allocation4 + $0x888] sm:$0xf0] }
 0x115   :  { %2308 = vmatpush.bf16.msrb.mxu3 %v3396_v34  ;;  %2267 = vmatmul.bf16.vlgmr.msrb.gmra.mxu0 %v4272_v35  ;;  %v3564_v35 = vor.u32 %v4023_v47, %v3561_v1  ;;  %v3481_v34 = vld [vmem:[#allocation4 + $0x738] sm:$0xf0]  ;;  %v4365_v57 = vpop.f32.mrf.mxu1  ;;  %v4049_v1 = vld [vmem:[#allocation4 + $0x8a4] sm:$0xf] }
 0x116   :  { %2315 = vmatpush.bf16.msra.mxu0 %v3516_v12  ;;  %2281 = vmatmul.bf16.vlgmr.msrb.gmra.mxu1 %v4276_v40  ;;  %v3617_v40 = vld [vmem:[#allocation4 + $0x848] sm:$0xf0]  ;;  %v4019_v12 = vld [vmem:[#allocation4 + $0x7b4] sm:$0xf]  ;;  %v3484_v59 = vor.u32 %v4003_v30, %v3481_v34 }
 0x117   :  { %2329 = vmatpush.bf16.msra.mxu1 %v3580_v37  ;;  %2295 = vmatmul.bf16.vlgmr.msrb.gmra.mxu2 %v4282_v32  ;;  %v3553_v32 = vld [vmem:[#allocation4 + $0x7c8] sm:$0xf0]  ;;  %v3620_v29 = vor.u32 %v4037_v21, %v3617_v40  ;;  %v3548_v61 = vor.u32 %v4019_v12, %v3545_v50  ;;  %v4045_v50 = vld [vmem:[#allocation4 + $0x884] sm:$0xf] }
 0x118   :  { %2343 = vmatpush.bf16.msra.mxu2 %v3644_v42  ;;  %2309 = vmatmul.bf16.vlgmr.msrb.gmra.mxu3 %v4286_v41  ;;  %v1921_v41 = vadd.f32 %v4330_v49, %v1907_v39  ;;  %v3556_v27 = vor.u32 %v4021_v19, %v3553_v32  ;;  %v4361_v37 = vpop.f32.mrf.mxu2  ;;  %v3684_v42 = vor.u32 %v4053_v24, %v3681_v25  ;;  %v3657_v32 = vld [vmem:[#allocation4 + $0x898] sm:$0xf0]  ;;  %v3997_v25 = vld [vmem:[#allocation4 + $0x704] sm:$0xf]  ;;  %v3521_v30 = vld [vmem:[#allocation4 + $0x788] sm:$0xf0] }
 0x119   :  { %2357 = vmatpush.bf16.msra.mxu3 %v3708_v55  ;;  %v1933_v49 = vadd.f32 %v4324_v22, %v1919_v23  ;;  %v1990_v55 = vpop.f32.mrf.mxu0  ;;  %v3676_v22 = vor.u32 %v4051_v56, %v3673_v60  ;;  %v3585_v34 = vld [vmem:[#allocation4 + $0x808] sm:$0xf0]  ;;  %v3652_v60 = vor.u32 %v4045_v50, %v3649_v52 }
 0x11a   :  { %2316 = vmatpush.bf16.msra.mxu0 %v3508_v43  ;;  %v1935_v53 = vadd.f32 %v4335_v44, %v1921_v41  ;;  %v3473_v43 = vld [vmem:[#allocation4 + $0x728] sm:$0xf0]  ;;  %v4033_v44 = vld [vmem:[#allocation4 + $0x824] sm:$0xf] }
 0x11b   :  { %2330 = vmatpush.bf16.msra.mxu1 %v3572_v3  ;;  %v4017_v3 = vld [vmem:[#allocation4 + $0x7a4] sm:$0xf]  ;;  %v1947_v47 = vadd.f32 %v4326_v28, %v1933_v49  ;;  %v3476_v9 = vor.u32 %v4001_v0, %v3473_v43  ;;  %v3604_v13 = vor.u32 %v4033_v44, %v3601_v31  ;;  %v3593_v28 = vld [vmem:[#allocation4 + $0x818] sm:$0xf0]  ;;  %v4067_v43 = vld [vmem:[%s4442_s3 + $0x30] sm:$0xff] }
 0x11c   :  { %2344 = vmatpush.bf16.msra.mxu2 %v3636_v4  ;;  %v4367_v4 = vpop.f32.mrf.mxu3  ;;  %v3540_v39 = vor.u32 %v4017_v3, %v3537_v5  ;;  %v3596_v24 = vor.u32 %v4031_v18, %v3593_v28  ;;  %v4061_v28 = vld [vmem:[%s4442_s3] sm:$0xff] }
 0x11d   :  { %2358 = vmatpush.bf16.msra.mxu3 %v3700_v63  ;;  %v1949_v63 = vadd.f32 %v4338_v10, %v1935_v53  ;;  %v1961_v10 = vadd.f32 %v4333_v36, %v1947_v47  ;;  %v2058_v40 = vpop.f32.mrf.mxu1  ;;  %v4029_v36 = vld [vmem:[#allocation4 + $0x804] sm:$0xf] }
 0x11e   :  { %2317 = vmatpush.bf16.msra.mxu0 %v3500_v15  ;;  %v3465_v15 = vld [vmem:[#allocation4 + $0x718] sm:$0xf0]  ;;  %v3588_v56 = vor.u32 %v4029_v36, %v3585_v34  ;;  %v4075_v36 = vld [vmem:[%s4442_s3 + $0x70] sm:$0xff] }
 0x11f   :  { %2331 = vmatpush.bf16.msra.mxu1 %v3564_v35  ;;  %v1963_v11 = vadd.f32 %v4347_v7, %v1949_v63  ;;  %v4015_v35 = vld [vmem:[#allocation4 + $0x794] sm:$0xf]  ;;  %v3468_v7 = vor.u32 %v3999_v17, %v3465_v15  ;;  %v1975_v12 = vadd.f32 %v4341_v33, %v1961_v10 }
 0x120   :  { %2345 = vmatpush.bf16.msra.mxu2 %v3628_v16  ;;  %v3668_v16 = vor.u32 %v4049_v1, %v3665_v8  ;;  %v2018_v21 = vpop.f32.mrf.mxu2  ;;  %v3532_v41 = vor.u32 %v4015_v35, %v3529_v58  ;;  %v4064_v8 = vld [vmem:[%s4442_s3 + $0x18] sm:$0xff] }
 0x121   :  { %2359 = vmatpush.bf16.msra.mxu3 %v3692_v20  ;;  %v2044_v19 = vpop.f32.mrf.mxu0  ;;  %v4047_v20 = vld [vmem:[#allocation4 + $0x894] sm:$0xf]  ;;  %v1977_v23 = vadd.f32 %v4357_v54, %v1963_v11  ;;  %v1989_v49 = vadd.f32 %v4345_v2, %v1975_v12 }
 0x122   :  { %2318 = vmatpush.bf16.msra.mxu0 %v3492_v26  ;;  %v3457_v26 = vld [vmem:[#allocation4 + $0x708] sm:$0xf0] }
 0x123   :  { %2332 = vmatpush.bf16.msra.mxu1 %v3556_v27  ;;  %v4013_v27 = vld [vmem:[#allocation4 + $0x784] sm:$0xf]  ;;  %v3460_v54 = vor.u32 %v3997_v25, %v3457_v26  ;;  %v424_v26 = vperm.slane %v4328_v48, 1 }
 0x124   :  { %2346 = vmatpush.bf16.msra.mxu2 %v3620_v29  ;;  %v3660_v29 = vor.u32 %v4047_v20, %v3657_v32  ;;  %v2032_v6 = vpop.f32.mrf.mxu3  ;;  %v3524_v53 = vor.u32 %v4013_v27, %v3521_v30 }
 0x125   :  { %2360 = vmatpush.bf16.msra.mxu3 %v3684_v42  ;;  %v1991_v42 = vadd.f32 %v1990_v55, %v1977_v23  ;;  %v2060_v2 = vpop.f32.mrf.mxu1 }
 0x126   :  { %2319 = vmatpush.bf16.msra.mxu0 %v3484_v59  ;;  %v4068_v59 = vld [vmem:[%s4442_s3 + $0x38] sm:$0xff] }
 0x127   :  { %2333 = vmatpush.bf16.msra.mxu1 %v3548_v61  ;;  %v2005_v33 = vadd.f32 %v4365_v57, %v1991_v42  ;;  %v2003_v61 = vadd.f32 %v4349_v14, %v1989_v49  ;;  %v4074_v49 = vld [vmem:[%s4442_s3 + $0x68] sm:$0xff] }
 0x128   :  { %2347 = vmatpush.bf16.msra.mxu2 %v3612_v62  ;;  %v2072_v55 = vpop.f32.mrf.mxu2 }
 0x129   :  { %2361 = vmatpush.bf16.msra.mxu3 %v3676_v22  ;;  %v2019_v62 = vadd.f32 %v2018_v21, %v2005_v33  ;;  %v2046_v0 = vpop.f32.mrf.mxu0  ;;  %v2017_v3 = vadd.f32 %v4361_v37, %v2003_v61  ;;  %v4066_v22 = vld [vmem:[%s4442_s3 + $0x28] sm:$0xff] }
 0x12a   :  { %2320 = vmatpush.bf16.msra.mxu0 %v3476_v9 }
 0x12b   :  { %2334 = vmatpush.bf16.msra.mxu1 %v3540_v39  ;;  %v2033_v14 = vadd.f32 %v2032_v6, %v2019_v62  ;;  %v2031_v5 = vadd.f32 %v4367_v4, %v2017_v3  ;;  %v4063_v39 = vld [vmem:[%s4442_s3 + $0x10] sm:$0xff] }
 0x12c   :  { %2348 = vmatpush.bf16.msra.mxu2 %v3604_v13  ;;  %v2086_v57 = vpop.f32.mrf.mxu3 }
 0x12d   :  { %2362 = vmatpush.bf16.msra.mxu3 %v3668_v16  ;;  %v2047_v44 = vadd.f32 %v2046_v0, %v2033_v14  ;;  %v2045_v31 = vadd.f32 %v2044_v19, %v2031_v5  ;;  %v4062_v16 = vld [vmem:[%s4442_s3 + $0x8] sm:$0xff]  ;;  %v4072_v0 = vld [vmem:[%s4442_s3 + $0x58] sm:$0xff]  ;;  %v4071_v14 = vld [vmem:[%s4442_s3 + $0x50] sm:$0xff] }
 0x12e   :  { %2321 = vmatpush.bf16.msra.mxu0 %v3468_v7 }
 0x12f   :  { %2335 = vmatpush.bf16.msra.mxu1 %v3532_v41  ;;  %v2059_v63 = vadd.f32 %v2058_v40, %v2045_v31 }
 0x130   :  { %2349 = vmatpush.bf16.msra.mxu2 %v3596_v24  ;;  %v2074_v47 = vpop.f32.mrf.mxu2 }
 0x131   :  { %2363 = vmatpush.bf16.msra.mxu3 %v3660_v29  ;;  %v2073_v4 = vadd.f32 %v2072_v55, %v2059_v63  ;;  %v4076_v29 = vld [vmem:[%s4442_s3 + $0x78] sm:$0xff] }
 0x132   :  { %2322 = vmatpush.bf16.msra.mxu0 %v3460_v54  ;;  %v2100_v37 = vpop.f32.mrf.mxu0 }
 0x133   :  { %2336 = vmatpush.bf16.msra.mxu1 %v3524_v53  ;;  %v2087_v13 = vadd.f32 %v2086_v57, %v2073_v4 }
 0x134   :  { %2350 = vmatpush.bf16.msra.mxu2 %v3588_v56  ;;  %v2088_v1 = vpop.f32.mrf.mxu3 }
 0x135   :  { %2364 = vmatpush.bf16.msra.mxu3 %v3652_v60  ;;  %2323 = vmatmul.bf16.vlgmr.msra.gmra.mxu0 %v4284_v38  ;;  %v4065_v38 = vld [vmem:[%s4442_s3 + $0x20] sm:$0xff]  ;;  %v2101_v35 = vadd.f32 %v2100_v37, %v2087_v13 }
 0x136   :  { %2509 = vmatpush.bf16.msrb.mxu0 %v4068_v59  ;;  %2337 = vmatmul.bf16.vlgmr.msra.gmra.mxu1 %v4288_v46  ;;  %v2114_v46 = vpop.f32.mrf.mxu1  ;;  %v4073_v60 = vld [vmem:[%s4442_s3 + $0x60] sm:$0xff] }
 0x137   :  { %2351 = vmatmul.bf16.vlgmr.msra.gmra.mxu2 %v4294_v45  ;;  %v2061_v45 = vadd.f32 %v2060_v2, %v2047_v44  ;;  %v2115_v18 = vadd.f32 %v2114_v46, %v2101_v35  ;;  %2523 = vmatpush.bf16.msrb.mxu1 %v4076_v29 }
 0x138   :  { %2365 = vmatmul.bf16.vlgmr.msra.gmra.mxu3 %v4296_v51 }
 0x139   :  { %v2075_v51 = vadd.f32 %v2074_v47, %v2061_v45  ;;  %v2371_v19 = vmax.f32 %v2115_v18, 0.0  ;;  %v4070_v47 = vld [vmem:[%s4442_s3 + $0x48] sm:$0xff] }
 0x13a   :  { %2510 = vmatpush.bf16.msrb.mxu0 %v4067_v43  ;;  %v2102_v11 = vpop.f32.mrf.mxu0  ;;  %v2128_v32 = vpop.f32.mrf.mxu2 }
 0x13b   :  { %v2089_v9 = vadd.f32 %v2088_v1, %v2075_v51  ;;  %v2129_v34 = vadd.f32 %v2128_v32, %v424_v26  ;;  %2524 = vmatpush.bf16.msrb.mxu1 %v4075_v36  ;;  %v4069_v51 = vld [vmem:[%s4442_s3 + $0x40] sm:$0xff] }
 0x13c   :  { %v2142_v21 = vpop.f32.mrf.mxu3 }
 0x13d   :  { %v2103_v17 = vadd.f32 %v2102_v11, %v2089_v9  ;;  %v2143_v42 = vadd.f32 %v2142_v21, %v2129_v34 }
 0x13e   :  { %2511 = vmatpush.bf16.msrb.mxu0 %v4066_v22  ;;  %v2116_v15 = vpop.f32.mrf.mxu1 }
 0x13f   :  { %v2117_v58 = vadd.f32 %v2116_v15, %v2103_v17  ;;  %2525 = vmatpush.bf16.msrb.mxu1 %v4074_v49  ;;  %v4085_v49 = vld [vmem:[#allocation7] ss:$0 sm:$0xff] }
 0x141   :  { %v2373_v10 = vmax.f32 %v2117_v58, 0.0 }
 0x142   :  { %2512 = vmatpush.bf16.msrb.mxu0 %v4065_v38  ;;  %v2130_v40 = vpop.f32.mrf.mxu2 }
 0x143   :  { %v2375_v20 = vpack.c.bf16 %v2373_v10, %v2371_v19  ;;  %v2131_v6 = vadd.f32 %v2130_v40, %v424_v26  ;;  %2526 = vmatpush.bf16.msrb.mxu1 %v4073_v60 }
 0x144   :  { %v2144_v7 = vpop.f32.mrf.mxu3 }
 0x145   :  { %v2145_v53 = vadd.f32 %v2144_v7, %v2131_v6 }
 0x146   :  { %2513 = vmatpush.bf16.msrb.mxu0 %v4064_v8 }
 0x147   :  { %2527 = vmatpush.bf16.msrb.mxu1 %v4072_v0 }
 0x14a   :  { %2514 = vmatpush.bf16.msrb.mxu0 %v4063_v39 }
 0x14b   :  { %2528 = vmatpush.bf16.msrb.mxu1 %v4071_v14 }
 0x14e   :  { %2515 = vmatpush.bf16.msrb.mxu0 %v4062_v16 }
 0x14f   :  { %2529 = vmatpush.bf16.msrb.mxu1 %v4070_v47 }
 0x152   :  { %2516 = vmatpush.bf16.msrb.mxu0 %v4061_v28  ;;  %v2156_v23 = vpop.f32.mrf.mxu0 }
 0x153   :  { %v2170_v41 = vpop.f32.mrf.mxu1  ;;  %v2157_v48 = vadd.f32 %v2156_v23, %v2143_v42  ;;  %2530 = vmatpush.bf16.msrb.mxu1 %v4069_v51 }
 0x155   :  { %2517 = vmatmul.bf16.vlgmr.msrb.gmra.mxu0 %v2375_v20  ;;  %v2171_v59 = vadd.f32 %v2170_v41, %v2157_v48 }
 0x15a   :  { %v2184_v24 = vpop.f32.mrf.mxu2  ;;  %v2158_v27 = vpop.f32.mrf.mxu0 }
 0x15b   :  { %v2198_v25 = vpop.f32.mrf.mxu3  ;;  %v2172_v30 = vpop.f32.mrf.mxu1  ;;  %v2159_v55 = vadd.f32 %v2158_v27, %v2145_v53  ;;  %v2185_v62 = vadd.f32 %v2184_v24, %v2171_v59 }
 0x15d   :  { %v2173_v43 = vadd.f32 %v2172_v30, %v2159_v55  ;;  %v2199_v3 = vadd.f32 %v2198_v25, %v2185_v62 }
 0x162   :  { %v2186_v12 = vpop.f32.mrf.mxu2 }
 0x163   :  { %v2200_v50 = vpop.f32.mrf.mxu3  ;;  %v2187_v57 = vadd.f32 %v2186_v12, %v2173_v43 }
 0x165   :  { %v2201_v37 = vadd.f32 %v2200_v50, %v2187_v57 }
 0x172   :  { %v2212_v52 = vpop.f32.mrf.mxu0 }
 0x173   :  { %v2226_v54 = vpop.f32.mrf.mxu1  ;;  %v2213_v5 = vadd.f32 %v2212_v52, %v2199_v3 }
 0x175   :  { %v2227_v46 = vadd.f32 %v2226_v54, %v2213_v5 }
 0x17a   :  { %v2240_v56 = vpop.f32.mrf.mxu2  ;;  %v2214_v61 = vpop.f32.mrf.mxu0 }
 0x17b   :  { %v2254_v33 = vpop.f32.mrf.mxu3  ;;  %v2228_v2 = vpop.f32.mrf.mxu1  ;;  %v2215_v45 = vadd.f32 %v2214_v61, %v2201_v37  ;;  %v2241_v63 = vadd.f32 %v2240_v56, %v2227_v46 }
 0x17d   :  { %v2229_v8 = vadd.f32 %v2228_v2, %v2215_v45  ;;  %v2255_v9 = vadd.f32 %v2254_v33, %v2241_v63 }
 0x182   :  { %v2242_v22 = vpop.f32.mrf.mxu2 }
 0x183   :  { %v2256_v44 = vpop.f32.mrf.mxu3  ;;  %v2243_v11 = vadd.f32 %v2242_v22, %v2229_v8 }
 0x185   :  { %v2257_v15 = vadd.f32 %v2256_v44, %v2243_v11 }
 0x192   :  { %v2268_v31 = vpop.f32.mrf.mxu0 }
 0x193   :  { %v2282_v38 = vpop.f32.mrf.mxu1  ;;  %v2269_v13 = vadd.f32 %v2268_v31, %v2255_v9 }
 0x195   :  { %v2283_v35 = vadd.f32 %v2282_v38, %v2269_v13 }
 0x19a   :  { %v2296_v1 = vpop.f32.mrf.mxu2  ;;  %v2270_v39 = vpop.f32.mrf.mxu0 }
 0x19b   :  { %v2310_v4 = vpop.f32.mrf.mxu3  ;;  %v2284_v17 = vpop.f32.mrf.mxu1  ;;  %v2271_v16 = vadd.f32 %v2270_v39, %v2257_v15  ;;  %v2297_v18 = vadd.f32 %v2296_v1, %v2283_v35 }
 0x19d   :  { %v2285_v19 = vadd.f32 %v2284_v17, %v2271_v16  ;;  %v2311_v32 = vadd.f32 %v2310_v4, %v2297_v18 }
 0x1a2   :  { %v2298_v58 = vpop.f32.mrf.mxu2 }
 0x1a3   :  { %v2312_v28 = vpop.f32.mrf.mxu3  ;;  %v2299_v21 = vadd.f32 %v2298_v58, %v2285_v19 }
 0x1a5   :  { %v2313_v23 = vadd.f32 %v2312_v28, %v2299_v21 }
 0x1b2   :  { %v2324_v10 = vpop.f32.mrf.mxu0 }
 0x1b3   :  { %v2338_v20 = vpop.f32.mrf.mxu1  ;;  %v2325_v40 = vadd.f32 %v2324_v10, %v2311_v32 }
 0x1b5   :  { %v2339_v25 = vadd.f32 %v2338_v20, %v2325_v40 }
 0x1ba   :  { %v2352_v7 = vpop.f32.mrf.mxu2  ;;  %v2326_v24 = vpop.f32.mrf.mxu0 }
 0x1bb   :  { %v2366_v41 = vpop.f32.mrf.mxu3  ;;  %v2327_v26 = vadd.f32 %v2326_v24, %v2313_v23  ;;  %v2353_v27 = vadd.f32 %v2352_v7, %v2339_v25  ;;  %v2340_v29 = vpop.f32.mrf.mxu1 }
 0x1bd   :  { %v2341_v30 = vadd.f32 %v2340_v29, %v2327_v26  ;;  %v2367_v34 = vadd.f32 %v2366_v41, %v2353_v27 }
 0x1bf   :  { %v2372_v52 = vmax.f32 %v2367_v34, 0.0 }
 0x1c2   :  { %v2354_v36 = vpop.f32.mrf.mxu2 }
 0x1c3   :  { %v2355_v12 = vadd.f32 %v2354_v36, %v2341_v30  ;;  %v2368_v42 = vpop.f32.mrf.mxu3 }
 0x1c5   :  { %v2369_v50 = vadd.f32 %v2368_v42, %v2355_v12 }
 0x1c7   :  { %v2374_v6 = vmax.f32 %v2369_v50, 0.0 }
 0x1c9   :  { %v2376_v54 = vpack.c.bf16 %v2374_v6, %v2372_v52 }
 0x1cb   :  { %2531 = vmatmul.bf16.vlgmr.msrb.gmra.mxu1 %v2376_v54 }
 0x1d2   :  { %v2518_v48 = vpop.f32.mrf.mxu0 }
 0x1d3   :  { %v2519_v53 = vadd.f32 %v4085_v49, %v2518_v48 }
 0x1da   :  { %v2520_v33 = vpop.f32.mrf.mxu0 }
 0x1db   :  { %v2521_v61 = vadd.f32 %v4085_v49, %v2520_v33 }
 0x248   :  { %v2532_v56 = vpop.f32.mrf.mxu1 }
 0x249   :  { %v2533_v60 = vadd.f32 %v2532_v56, %v2519_v53 }
 0x24b   :  { %v2537_v59 = vsub.f32 0.0, %v2533_v60 }
 0x24d   :  { %v2539_v55 = vmul.f32 1.442695, %v2537_v59 }
 0x24f   :  { %4086 = vpow2.f32 %v2539_v55 }
 0x250   :  { %v2534_v62 = vpop.f32.mrf.mxu1 }
 0x251   :  { %v2535_v0 = vadd.f32 %v2534_v62, %v2521_v61 }
 0x253   :  { %v2538_v2 = vsub.f32 0.0, %v2535_v0 }
 0x255   :  { %v4087_v43 = vpop.eup %4086  ;;  %v2541_v3 = vmul.f32 1.442695, %v2538_v2 }
 0x256   :  { %v2543_v57 = vadd.f32 1.0, %v4087_v43 }
 0x257   :  { %4088 = vpow2.f32 %v2541_v3 }
 0x258   :  { %4090 = vrcp.f32 %v2543_v57 }
 0x25d   :  { %v4089_v14 = vpop.eup %4088 }
 0x25e   :  { %v4091_v22 = vpop.eup %4090  ;;  %v2544_v5 = vadd.f32 1.0, %v4089_v14 }
 0x25f   :  { %2548 = vst.msk [vmem:[%s4444_s5] sm:$0xff] %vm2547_vm0, %v4091_v22 }
 0x260   :  { %4092 = vrcp.f32 %v2544_v5 }
 0x266   :  { %v4093_v44 = vpop.eup %4092 }
 0x267   :  { %2549 = vst.msk [vmem:[%s4444_s5 + $0x8] sm:$0xff] %vm2547_vm0, %v4093_v44 }
 0x268   :  { %2554 = vsyncpa [#allocation3], 1 }
 0x269   :  { %2555 = vsyncpa [#allocation5], 1 }
 0x26a   :  { %2556 = vsyncpa [#allocation8], 1 }

</bundles_post_ra>
